<compile_context>
chip_gen: v6e
topology: v6e:2x2x1
jax: 0.10.0
libtpu: 0.0.40
codegen_flags: <defaults>
</compile_context>

<pallas_src>
import functools

import jax
import jax.numpy as jnp
from jax.experimental import pallas as pl
from jax.experimental.pallas import tpu as pltpu

_HP = jax.lax.Precision.HIGHEST


# ---------------------------------------------------------------------------
# Kernels
# ---------------------------------------------------------------------------
def _caamsft_small_kernel(x0_ref, x1_ref, w0_ref, b0_ref, w1_ref, b1_ref,
                          o_ref, *, n_feat):
    """Small-C (VPU) path.

    x0/x1/o: (C, S_tile, 128) VMEM blocks (spatial folded onto sublanes+lanes).
    w0/w1:   (2C*C,) f32 in SMEM, row-major (out, in); rows [:C] = scale branch.
    b0/b1:   (2C,)   f32 in SMEM; b1[:C] already has the '+1' folded in.
    """
    C = n_feat
    x1 = [x1_ref[c].astype(jnp.float32) for c in range(C)]

    # conv0 of both branches (stacked) + leaky_relu(0.1), as scalar x slab MACs.
    h = []
    for o in range(2 * C):
        acc = x1[0] * w0_ref[o * C]
        for c in range(1, C):
            acc = acc + x1[c] * w0_ref[o * C + c]
        acc = acc + b0_ref[o]
        h.append(jnp.where(acc >= 0, acc, 0.1 * acc))

    # conv1 of both branches + SFT epilogue, one output channel at a time.
    for oc in range(C):
        scale = h[0] * w1_ref[oc * C]
        for c in range(1, C):
            scale = scale + h[c] * w1_ref[oc * C + c]
        scale = scale + b1_ref[oc]                        # '+1' already folded
        shift = h[C] * w1_ref[(C + oc) * C]
        for c in range(1, C):
            shift = shift + h[C + c] * w1_ref[(C + oc) * C + c]
        shift = shift + b1_ref[C + oc]
        x0c = x0_ref[oc].astype(jnp.float32)
        o_ref[oc] = (x0c * scale + shift).astype(o_ref.dtype)


def _caamsft_mxu_kernel(x0_ref, x1_ref, w0_ref, b0_ref, w1_ref, b1_ref,
                        o_ref, *, n_feat):
    """Large-C (MXU) path.  x0/x1/o: (C, TL); w0/w1: (2C, C); b0/b1: (2C, 1)."""
    C = n_feat
    x0 = x0_ref[...].astype(jnp.float32)
    x1 = x1_ref[...].astype(jnp.float32)
    h = jnp.dot(w0_ref[...], x1, preferred_element_type=jnp.float32,
                precision=_HP) + b0_ref[...]
    h = jnp.where(h >= 0, h, 0.1 * h)                     # leaky_relu(0.1)
    w1 = w1_ref[...]
    b1 = b1_ref[...]
    scale = jnp.dot(w1[:C, :], h[:C, :], preferred_element_type=jnp.float32,
                    precision=_HP) + b1[:C, :]            # '+1' already folded
    shift = jnp.dot(w1[C:, :], h[C:, :], preferred_element_type=jnp.float32,
                    precision=_HP) + b1[C:, :]
    o_ref[...] = (x0 * scale + shift).astype(o_ref.dtype)


# ---------------------------------------------------------------------------
# Tiling helpers (per-generation VMEM-aware)
# ---------------------------------------------------------------------------
def _tpu_vmem_capacity():
    """Per-core VMEM capacity in bytes (64 MiB fallback = v7x lower bound)."""
    try:
        info = pltpu.get_tpu_info()
        for name in ("vmem_capacity_bytes", "vmem_size_bytes"):
            cap = getattr(info, name, None)
            if cap:
                return int(cap)
    except Exception:
        pass
    return 64 * 2**20


def _gate_for_occupancy(n_batch, extent, tile, quantum, min_steps=4):
    """Shrink the tile so the (N, tiles) grid has >= min_steps blocks when the
    input is big enough -- keeps both v7x TensorCores busy."""
    if n_batch * pl.cdiv(extent, tile) >= min_steps or extent < 2 * quantum:
        return tile
    want = pl.cdiv(min_steps, n_batch)
    cap = max(quantum, (pl.cdiv(extent, want) // quantum) * quantum)
    return min(tile, cap)


def _pick_tile(extent, target, quantum):
    """Largest multiple of `quantum` <= target that divides `extent` (no masked
    tail); falls back to a plain multiple of `quantum`, or the full extent."""
    if extent <= target:
        return extent
    t = max(quantum, (target // quantum) * quantum)
    for cand in range(t, quantum - 1, -quantum):
        if extent % cand == 0:
            return cand
    return t


# ---------------------------------------------------------------------------
# pallas_call wrappers
# ---------------------------------------------------------------------------
def _caamsft_small(x0, x1, w0_flat, b0, w1_flat, b1):
    """x0/x1: (N, C, S, 128); weights/biases: flat f32 arrays kept in SMEM."""
    N, C, S, _ = x0.shape
    cap = _tpu_vmem_capacity()
    budget = int(cap * 0.45)
    itemsize = x0.dtype.itemsize
    # Per "sublane row of 128 lanes": 3 tensors x 2 pipeline buffers (in dtype)
    # + ~(2C + 8) f32 intermediate slabs (h, accumulators, casts).
    per_row = 128 * (6 * C * itemsize + (2 * C + 8) * 4)
    s_target = max(8, min(4096, budget // per_row))
    s_target = _gate_for_occupancy(N, S, s_target, 8)
    S_tile = _pick_tile(S, s_target, 8)
    n_s = pl.cdiv(S, S_tile)

    est = per_row * S_tile + (1 << 16)
    vmem_limit = int(min(max(2 * est, 16 * 2**20), int(cap * 0.9)))

    data_spec = pl.BlockSpec((None, C, S_tile, 128), lambda n, s: (n, 0, s, 0))
    smem_spec = pl.BlockSpec(memory_space=pltpu.MemorySpace.SMEM)

    return pl.pallas_call(
        functools.partial(_caamsft_small_kernel, n_feat=C),
        out_shape=jax.ShapeDtypeStruct((N, C, S, 128), x0.dtype),
        grid_spec=pltpu.PrefetchScalarGridSpec(
            num_scalar_prefetch=0,
            grid=(N, n_s),
            in_specs=[data_spec, data_spec,
                      smem_spec, smem_spec, smem_spec, smem_spec],
            out_specs=data_spec,
        ),
        compiler_params=pltpu.CompilerParams(
            dimension_semantics=("parallel", "parallel"),
            vmem_limit_bytes=vmem_limit,
        ),
    )(x0, x1, w0_flat, b0, w1_flat, b1)


def _caamsft_mxu(x0, x1, w0, b0, w1, b1):
    """x0/x1: (N, C, L); w0/w1: (2C, C); b0/b1: (2C, 1)."""
    N, C, L = x0.shape
    cap = _tpu_vmem_capacity()
    budget = int(cap * 0.45)
    itemsize = x0.dtype.itemsize
    # Per lane column: pipeline buffers + f32 intermediates (h, scale, shift).
    per_lane = 6 * C * itemsize + (4 * C + 8) * 4
    tl_target = max(128, min(65536, ((budget // per_lane) // 128) * 128))
    tl_target = _gate_for_occupancy(N, L, tl_target, 128)
    TL = _pick_tile(L, tl_target, 128)
    n_l = pl.cdiv(L, TL)

    est = per_lane * TL + 4 * (2 * C * C + 2 * C) * 4 + (1 << 16)
    vmem_limit = int(min(max(2 * est, 16 * 2**20), int(cap * 0.9)))

    data_spec = pl.BlockSpec((None, C, TL), lambda n, l: (n, 0, l))
    w_spec = pl.BlockSpec((2 * C, C), lambda n, l: (0, 0))
    b_spec = pl.BlockSpec((2 * C, 1), lambda n, l: (0, 0))

    return pl.pallas_call(
        functools.partial(_caamsft_mxu_kernel, n_feat=C),
        out_shape=jax.ShapeDtypeStruct((N, C, L), x0.dtype),
        grid_spec=pltpu.PrefetchScalarGridSpec(
            num_scalar_prefetch=0,
            grid=(N, n_l),
            in_specs=[data_spec, data_spec, w_spec, b_spec, w_spec, b_spec],
            out_specs=data_spec,
        ),
        compiler_params=pltpu.CompilerParams(
            dimension_semantics=("parallel", "parallel"),
            vmem_limit_bytes=vmem_limit,
        ),
    )(x0, x1, w0, b0, w1, b1)


# ---------------------------------------------------------------------------
# Parameter packing / public forward
# ---------------------------------------------------------------------------
def pack_params(params):
    """Stack per-branch 1x1-conv weights: rows [:C]=scale branch, [C:]=shift.
    The '+1' of (scale + 1) is folded into the scale-branch output bias."""
    w0 = jnp.concatenate([params["w_s0"], params["w_h0"]], axis=0)         # (2C, C)
    b0 = jnp.concatenate([params["b_s0"], params["b_h0"]], axis=0)         # (2C,)
    w1 = jnp.concatenate([params["w_s1"], params["w_h1"]], axis=0)         # (2C, C)
    b1 = jnp.concatenate([params["b_s1"] + 1.0, params["b_h1"]], axis=0)   # (2C,)
    return (w0.astype(jnp.float32), b0.astype(jnp.float32),
            w1.astype(jnp.float32), b1.astype(jnp.float32))


def caamsft_forward(x0_nchw, x1_nchw, params, *, vpu_max_feat=8):
    """NCHW in / NCHW out, matching the PyTorch CAAMSFT module forward."""
    N, C, H, W = x0_nchw.shape
    L = H * W
    w0, b0, w1, b1 = pack_params(params)

    if C > vpu_max_feat:
        out = _caamsft_mxu(x0_nchw.reshape(N, C, L), x1_nchw.reshape(N, C, L),
                           w0, b0[:, None], w1, b1[:, None])
        return out.reshape(N, C, H, W)

    # Small-C path: fold spatial onto sublanes so vregs / VMEM tiles are dense.
    Lp = -(-L // 128) * 128
    x0l = x0_nchw.reshape(N, C, L)
    x1l = x1_nchw.reshape(N, C, L)
    if Lp != L:
        pad = ((0, 0), (0, 0), (0, Lp - L))
        x0l = jnp.pad(x0l, pad)
        x1l = jnp.pad(x1l, pad)
    S = Lp // 128
    out = _caamsft_small(x0l.reshape(N, C, S, 128), x1l.reshape(N, C, S, 128),
                         w0.reshape(-1), b0, w1.reshape(-1), b1)
    out = out.reshape(N, C, Lp)
    if Lp != L:
        out = out[:, :, :L]
    return out.reshape(N, C, H, W)


# ---------------------------------------------------------------------------
# Test scaffolding
# ---------------------------------------------------------------------------
def init_params(key, n_feat):
    """Deterministic synthetic parameters. Conv2d(n,n,1) weight stored as
    (C_out, C_in) (PyTorch layout squeezed), bias as (C_out,)."""
    keys = jax.random.split(key, 8)
    s = 1.0 / jnp.sqrt(n_feat)

    def w(k):
        return jax.random.normal(k, (n_feat, n_feat), jnp.float32) * s

    def b(k):
        return jax.random.normal(k, (n_feat,), jnp.float32) * 0.1

    return {
        "w_s0": w(keys[0]), "b_s0": b(keys[1]),
        "w_s1": w(keys[2]), "b_s1": b(keys[3]),
        "w_h0": w(keys[4]), "b_h0": b(keys[5]),
        "w_h1": w(keys[6]), "b_h1": b(keys[7]),
    }


def _reference(x0, x1, p):
    """Pure-JAX reference (NCHW), full-precision contraction."""
    def conv1x1(x, w, b):
        return jnp.einsum("oi,nihw->nohw", w, x,
                          precision=_HP) + b[None, :, None, None]

    h = conv1x1(x1, p["w_s0"], p["b_s0"])
    h = jnp.where(h >= 0, h, 0.1 * h)
    scale = conv1x1(h, p["w_s1"], p["b_s1"])
    g = conv1x1(x1, p["w_h0"], p["b_h0"])
    g = jnp.where(g >= 0, g, 0.1 * g)
    shift = conv1x1(g, p["w_h1"], p["b_h1"])
    return x0 * (scale + 1.0) + shift


if __name__ == "__main__":
    key = jax.random.PRNGKey(0)
    k0, k1, kp, k2, k3, kq = jax.random.split(key, 6)

    # Small-shape check (exercises the folded-sublane VPU path, C=4).
    N, C, H, W = 2, 4, 16, 16
    x0 = jax.random.normal(k0, (N, C, H, W), jnp.float32)   # features to modulate
    x1 = jax.random.normal(k1, (N, C, H, W), jnp.float32)   # conditioning features
    params = init_params(kp, C)
    out = jax.block_until_ready(caamsft_forward(x0, x1, params))
    ref = _reference(x0, x1, params)
    assert out.shape == (N, C, H, W)
    assert jnp.allclose(out, ref, atol=1e-4, rtol=1e-4), "small-C mismatch"

    # Production channel count (exercises the MXU path; n_feat=64 in D2SR_s3).
    C2 = 64
    x0b = jax.random.normal(k2, (N, C2, H, W), jnp.float32)
    x1b = jax.random.normal(k3, (N, C2, H, W), jnp.float32)
    params2 = init_params(kq, C2)
    out2 = jax.block_until_ready(caamsft_forward(x0b, x1b, params2))
    ref2 = _reference(x0b, x1b, params2)
    assert out2.shape == (N, C2, H, W)
    assert jnp.allclose(out2, ref2, atol=1e-3, rtol=1e-3), "MXU-path mismatch"

    # TODO(synk): only the CAAMSFT sub-block of D2SR_s3 is kernelized here; the
    # surrounding 3x3-conv networks (Encoder/MANet/SR, ConvTranspose,
    # PixelShuffle, softmax heads) are left to XLA.
    print("KERNEL_OK")
</pallas_src>

<mosaic_0001>
module attributes {stable_mosaic.version = 11 : i64} {
  func.func @_caamsft_small_kernel(%arg0: i32, %arg1: i32, %arg2: memref<1x4x2x128xf32, #tpu.memory_space<vmem>>, %arg3: memref<1x4x2x128xf32, #tpu.memory_space<vmem>>, %arg4: memref<32xf32, #tpu.memory_space<smem>>, %arg5: memref<8xf32, #tpu.memory_space<smem>>, %arg6: memref<32xf32, #tpu.memory_space<smem>>, %arg7: memref<8xf32, #tpu.memory_space<smem>>, %arg8: memref<1x4x2x128xf32, #tpu.memory_space<vmem>>) attributes {dimension_semantics = [#tpu.dimension_semantics<parallel>, #tpu.dimension_semantics<parallel>], iteration_bounds = array<i64: 2, 1>, scalar_prefetch = 0 : i64, scratch_operands = 0 : i64, tpu.core_type = #tpu.core_type<tc>, window_params = [{transform_indices = @transform_0, window_bounds = array<i64: 1, 4, 2, 128>}, {transform_indices = @transform_1, window_bounds = array<i64: 1, 4, 2, 128>}, {transform_indices = @transform_2, window_bounds = array<i64: 32>}, {transform_indices = @transform_3, window_bounds = array<i64: 8>}, {transform_indices = @transform_4, window_bounds = array<i64: 32>}, {transform_indices = @transform_5, window_bounds = array<i64: 8>}, {transform_indices = @transform_6, window_bounds = array<i64: 1, 4, 2, 128>}]} {
    %c0 = arith.constant 0 : index
    %c0_0 = arith.constant 0 : index
    %c0_1 = arith.constant 0 : index
    %c0_2 = arith.constant 0 : index
    %0 = vector.load %arg3[%c0, %c0_0, %c0_1, %c0_2] : memref<1x4x2x128xf32, #tpu.memory_space<vmem>>, vector<1x1x2x128xf32>
    %1 = vector.shape_cast %0 : vector<1x1x2x128xf32> to vector<2x128xf32>
    %c0_3 = arith.constant 0 : index
    %c1 = arith.constant 1 : index
    %c0_4 = arith.constant 0 : index
    %c0_5 = arith.constant 0 : index
    %2 = vector.load %arg3[%c0_3, %c1, %c0_4, %c0_5] : memref<1x4x2x128xf32, #tpu.memory_space<vmem>>, vector<1x1x2x128xf32>
    %3 = vector.shape_cast %2 : vector<1x1x2x128xf32> to vector<2x128xf32>
    %c0_6 = arith.constant 0 : index
    %c2 = arith.constant 2 : index
    %c0_7 = arith.constant 0 : index
    %c0_8 = arith.constant 0 : index
    %4 = vector.load %arg3[%c0_6, %c2, %c0_7, %c0_8] : memref<1x4x2x128xf32, #tpu.memory_space<vmem>>, vector<1x1x2x128xf32>
    %5 = vector.shape_cast %4 : vector<1x1x2x128xf32> to vector<2x128xf32>
    %c0_9 = arith.constant 0 : index
    %c3 = arith.constant 3 : index
    %c0_10 = arith.constant 0 : index
    %c0_11 = arith.constant 0 : index
    %6 = vector.load %arg3[%c0_9, %c3, %c0_10, %c0_11] : memref<1x4x2x128xf32, #tpu.memory_space<vmem>>, vector<1x1x2x128xf32>
    %7 = vector.shape_cast %6 : vector<1x1x2x128xf32> to vector<2x128xf32>
    %c0_12 = arith.constant 0 : index
    %8 = memref.load %arg4[%c0_12] : memref<32xf32, #tpu.memory_space<smem>>
    %9 = vector.broadcast %8 : f32 to vector<2x128xf32>
    %10 = arith.mulf %1, %9 : vector<2x128xf32>
    %c1_13 = arith.constant 1 : index
    %11 = memref.load %arg4[%c1_13] : memref<32xf32, #tpu.memory_space<smem>>
    %12 = vector.broadcast %11 : f32 to vector<2x128xf32>
    %13 = arith.mulf %3, %12 : vector<2x128xf32>
    %14 = arith.addf %10, %13 : vector<2x128xf32>
    %c2_14 = arith.constant 2 : index
    %15 = memref.load %arg4[%c2_14] : memref<32xf32, #tpu.memory_space<smem>>
    %16 = vector.broadcast %15 : f32 to vector<2x128xf32>
    %17 = arith.mulf %5, %16 : vector<2x128xf32>
    %18 = arith.addf %14, %17 : vector<2x128xf32>
    %c3_15 = arith.constant 3 : index
    %19 = memref.load %arg4[%c3_15] : memref<32xf32, #tpu.memory_space<smem>>
    %20 = vector.broadcast %19 : f32 to vector<2x128xf32>
    %21 = arith.mulf %7, %20 : vector<2x128xf32>
    %22 = arith.addf %18, %21 : vector<2x128xf32>
    %c0_16 = arith.constant 0 : index
    %23 = memref.load %arg5[%c0_16] : memref<8xf32, #tpu.memory_space<smem>>
    %24 = vector.broadcast %23 : f32 to vector<2x128xf32>
    %25 = arith.addf %22, %24 : vector<2x128xf32>
    %cst = arith.constant 0.000000e+00 : f32
    %26 = vector.broadcast %cst : f32 to vector<2x128xf32>
    %27 = arith.cmpf oge, %25, %26 : vector<2x128xf32>
    %cst_17 = arith.constant 1.000000e-01 : f32
    %28 = vector.broadcast %cst_17 : f32 to vector<2x128xf32>
    %29 = arith.mulf %28, %25 : vector<2x128xf32>
    %30 = arith.select %27, %25, %29 : vector<2x128xi1>, vector<2x128xf32>
    %c4 = arith.constant 4 : index
    %31 = memref.load %arg4[%c4] : memref<32xf32, #tpu.memory_space<smem>>
    %32 = vector.broadcast %31 : f32 to vector<2x128xf32>
    %33 = arith.mulf %1, %32 : vector<2x128xf32>
    %c5 = arith.constant 5 : index
    %34 = memref.load %arg4[%c5] : memref<32xf32, #tpu.memory_space<smem>>
    %35 = vector.broadcast %34 : f32 to vector<2x128xf32>
    %36 = arith.mulf %3, %35 : vector<2x128xf32>
    %37 = arith.addf %33, %36 : vector<2x128xf32>
    %c6 = arith.constant 6 : index
    %38 = memref.load %arg4[%c6] : memref<32xf32, #tpu.memory_space<smem>>
    %39 = vector.broadcast %38 : f32 to vector<2x128xf32>
    %40 = arith.mulf %5, %39 : vector<2x128xf32>
    %41 = arith.addf %37, %40 : vector<2x128xf32>
    %c7 = arith.constant 7 : index
    %42 = memref.load %arg4[%c7] : memref<32xf32, #tpu.memory_space<smem>>
    %43 = vector.broadcast %42 : f32 to vector<2x128xf32>
    %44 = arith.mulf %7, %43 : vector<2x128xf32>
    %45 = arith.addf %41, %44 : vector<2x128xf32>
    %c1_18 = arith.constant 1 : index
    %46 = memref.load %arg5[%c1_18] : memref<8xf32, #tpu.memory_space<smem>>
    %47 = vector.broadcast %46 : f32 to vector<2x128xf32>
    %48 = arith.addf %45, %47 : vector<2x128xf32>
    %cst_19 = arith.constant 0.000000e+00 : f32
    %49 = vector.broadcast %cst_19 : f32 to vector<2x128xf32>
    %50 = arith.cmpf oge, %48, %49 : vector<2x128xf32>
    %cst_20 = arith.constant 1.000000e-01 : f32
    %51 = vector.broadcast %cst_20 : f32 to vector<2x128xf32>
    %52 = arith.mulf %51, %48 : vector<2x128xf32>
    %53 = arith.select %50, %48, %52 : vector<2x128xi1>, vector<2x128xf32>
    %c8 = arith.constant 8 : index
    %54 = memref.load %arg4[%c8] : memref<32xf32, #tpu.memory_space<smem>>
    %55 = vector.broadcast %54 : f32 to vector<2x128xf32>
    %56 = arith.mulf %1, %55 : vector<2x128xf32>
    %c9 = arith.constant 9 : index
    %57 = memref.load %arg4[%c9] : memref<32xf32, #tpu.memory_space<smem>>
    %58 = vector.broadcast %57 : f32 to vector<2x128xf32>
    %59 = arith.mulf %3, %58 : vector<2x128xf32>
    %60 = arith.addf %56, %59 : vector<2x128xf32>
    %c10 = arith.constant 10 : index
    %61 = memref.load %arg4[%c10] : memref<32xf32, #tpu.memory_space<smem>>
    %62 = vector.broadcast %61 : f32 to vector<2x128xf32>
    %63 = arith.mulf %5, %62 : vector<2x128xf32>
    %64 = arith.addf %60, %63 : vector<2x128xf32>
    %c11 = arith.constant 11 : index
    %65 = memref.load %arg4[%c11] : memref<32xf32, #tpu.memory_space<smem>>
    %66 = vector.broadcast %65 : f32 to vector<2x128xf32>
    %67 = arith.mulf %7, %66 : vector<2x128xf32>
    %68 = arith.addf %64, %67 : vector<2x128xf32>
    %c2_21 = arith.constant 2 : index
    %69 = memref.load %arg5[%c2_21] : memref<8xf32, #tpu.memory_space<smem>>
    %70 = vector.broadcast %69 : f32 to vector<2x128xf32>
    %71 = arith.addf %68, %70 : vector<2x128xf32>
    %cst_22 = arith.constant 0.000000e+00 : f32
    %72 = vector.broadcast %cst_22 : f32 to vector<2x128xf32>
    %73 = arith.cmpf oge, %71, %72 : vector<2x128xf32>
    %cst_23 = arith.constant 1.000000e-01 : f32
    %74 = vector.broadcast %cst_23 : f32 to vector<2x128xf32>
    %75 = arith.mulf %74, %71 : vector<2x128xf32>
    %76 = arith.select %73, %71, %75 : vector<2x128xi1>, vector<2x128xf32>
    %c12 = arith.constant 12 : index
    %77 = memref.load %arg4[%c12] : memref<32xf32, #tpu.memory_space<smem>>
    %78 = vector.broadcast %77 : f32 to vector<2x128xf32>
    %79 = arith.mulf %1, %78 : vector<2x128xf32>
    %c13 = arith.constant 13 : index
    %80 = memref.load %arg4[%c13] : memref<32xf32, #tpu.memory_space<smem>>
    %81 = vector.broadcast %80 : f32 to vector<2x128xf32>
    %82 = arith.mulf %3, %81 : vector<2x128xf32>
    %83 = arith.addf %79, %82 : vector<2x128xf32>
    %c14 = arith.constant 14 : index
    %84 = memref.load %arg4[%c14] : memref<32xf32, #tpu.memory_space<smem>>
    %85 = vector.broadcast %84 : f32 to vector<2x128xf32>
    %86 = arith.mulf %5, %85 : vector<2x128xf32>
    %87 = arith.addf %83, %86 : vector<2x128xf32>
    %c15 = arith.constant 15 : index
    %88 = memref.load %arg4[%c15] : memref<32xf32, #tpu.memory_space<smem>>
    %89 = vector.broadcast %88 : f32 to vector<2x128xf32>
    %90 = arith.mulf %7, %89 : vector<2x128xf32>
    %91 = arith.addf %87, %90 : vector<2x128xf32>
    %c3_24 = arith.constant 3 : index
    %92 = memref.load %arg5[%c3_24] : memref<8xf32, #tpu.memory_space<smem>>
    %93 = vector.broadcast %92 : f32 to vector<2x128xf32>
    %94 = arith.addf %91, %93 : vector<2x128xf32>
    %cst_25 = arith.constant 0.000000e+00 : f32
    %95 = vector.broadcast %cst_25 : f32 to vector<2x128xf32>
    %96 = arith.cmpf oge, %94, %95 : vector<2x128xf32>
    %cst_26 = arith.constant 1.000000e-01 : f32
    %97 = vector.broadcast %cst_26 : f32 to vector<2x128xf32>
    %98 = arith.mulf %97, %94 : vector<2x128xf32>
    %99 = arith.select %96, %94, %98 : vector<2x128xi1>, vector<2x128xf32>
    %c16 = arith.constant 16 : index
    %100 = memref.load %arg4[%c16] : memref<32xf32, #tpu.memory_space<smem>>
    %101 = vector.broadcast %100 : f32 to vector<2x128xf32>
    %102 = arith.mulf %1, %101 : vector<2x128xf32>
    %c17 = arith.constant 17 : index
    %103 = memref.load %arg4[%c17] : memref<32xf32, #tpu.memory_space<smem>>
    %104 = vector.broadcast %103 : f32 to vector<2x128xf32>
    %105 = arith.mulf %3, %104 : vector<2x128xf32>
    %106 = arith.addf %102, %105 : vector<2x128xf32>
    %c18 = arith.constant 18 : index
    %107 = memref.load %arg4[%c18] : memref<32xf32, #tpu.memory_space<smem>>
    %108 = vector.broadcast %107 : f32 to vector<2x128xf32>
    %109 = arith.mulf %5, %108 : vector<2x128xf32>
    %110 = arith.addf %106, %109 : vector<2x128xf32>
    %c19 = arith.constant 19 : index
    %111 = memref.load %arg4[%c19] : memref<32xf32, #tpu.memory_space<smem>>
    %112 = vector.broadcast %111 : f32 to vector<2x128xf32>
    %113 = arith.mulf %7, %112 : vector<2x128xf32>
    %114 = arith.addf %110, %113 : vector<2x128xf32>
    %c4_27 = arith.constant 4 : index
    %115 = memref.load %arg5[%c4_27] : memref<8xf32, #tpu.memory_space<smem>>
    %116 = vector.broadcast %115 : f32 to vector<2x128xf32>
    %117 = arith.addf %114, %116 : vector<2x128xf32>
    %cst_28 = arith.constant 0.000000e+00 : f32
    %118 = vector.broadcast %cst_28 : f32 to vector<2x128xf32>
    %119 = arith.cmpf oge, %117, %118 : vector<2x128xf32>
    %cst_29 = arith.constant 1.000000e-01 : f32
    %120 = vector.broadcast %cst_29 : f32 to vector<2x128xf32>
    %121 = arith.mulf %120, %117 : vector<2x128xf32>
    %122 = arith.select %119, %117, %121 : vector<2x128xi1>, vector<2x128xf32>
    %c20 = arith.constant 20 : index
    %123 = memref.load %arg4[%c20] : memref<32xf32, #tpu.memory_space<smem>>
    %124 = vector.broadcast %123 : f32 to vector<2x128xf32>
    %125 = arith.mulf %1, %124 : vector<2x128xf32>
    %c21 = arith.constant 21 : index
    %126 = memref.load %arg4[%c21] : memref<32xf32, #tpu.memory_space<smem>>
    %127 = vector.broadcast %126 : f32 to vector<2x128xf32>
    %128 = arith.mulf %3, %127 : vector<2x128xf32>
    %129 = arith.addf %125, %128 : vector<2x128xf32>
    %c22 = arith.constant 22 : index
    %130 = memref.load %arg4[%c22] : memref<32xf32, #tpu.memory_space<smem>>
    %131 = vector.broadcast %130 : f32 to vector<2x128xf32>
    %132 = arith.mulf %5, %131 : vector<2x128xf32>
    %133 = arith.addf %129, %132 : vector<2x128xf32>
    %c23 = arith.constant 23 : index
    %134 = memref.load %arg4[%c23] : memref<32xf32, #tpu.memory_space<smem>>
    %135 = vector.broadcast %134 : f32 to vector<2x128xf32>
    %136 = arith.mulf %7, %135 : vector<2x128xf32>
    %137 = arith.addf %133, %136 : vector<2x128xf32>
    %c5_30 = arith.constant 5 : index
    %138 = memref.load %arg5[%c5_30] : memref<8xf32, #tpu.memory_space<smem>>
    %139 = vector.broadcast %138 : f32 to vector<2x128xf32>
    %140 = arith.addf %137, %139 : vector<2x128xf32>
    %cst_31 = arith.constant 0.000000e+00 : f32
    %141 = vector.broadcast %cst_31 : f32 to vector<2x128xf32>
    %142 = arith.cmpf oge, %140, %141 : vector<2x128xf32>
    %cst_32 = arith.constant 1.000000e-01 : f32
    %143 = vector.broadcast %cst_32 : f32 to vector<2x128xf32>
    %144 = arith.mulf %143, %140 : vector<2x128xf32>
    %145 = arith.select %142, %140, %144 : vector<2x128xi1>, vector<2x128xf32>
    %c24 = arith.constant 24 : index
    %146 = memref.load %arg4[%c24] : memref<32xf32, #tpu.memory_space<smem>>
    %147 = vector.broadcast %146 : f32 to vector<2x128xf32>
    %148 = arith.mulf %1, %147 : vector<2x128xf32>
    %c25 = arith.constant 25 : index
    %149 = memref.load %arg4[%c25] : memref<32xf32, #tpu.memory_space<smem>>
    %150 = vector.broadcast %149 : f32 to vector<2x128xf32>
    %151 = arith.mulf %3, %150 : vector<2x128xf32>
    %152 = arith.addf %148, %151 : vector<2x128xf32>
    %c26 = arith.constant 26 : index
    %153 = memref.load %arg4[%c26] : memref<32xf32, #tpu.memory_space<smem>>
    %154 = vector.broadcast %153 : f32 to vector<2x128xf32>
    %155 = arith.mulf %5, %154 : vector<2x128xf32>
    %156 = arith.addf %152, %155 : vector<2x128xf32>
    %c27 = arith.constant 27 : index
    %157 = memref.load %arg4[%c27] : memref<32xf32, #tpu.memory_space<smem>>
    %158 = vector.broadcast %157 : f32 to vector<2x128xf32>
    %159 = arith.mulf %7, %158 : vector<2x128xf32>
    %160 = arith.addf %156, %159 : vector<2x128xf32>
    %c6_33 = arith.constant 6 : index
    %161 = memref.load %arg5[%c6_33] : memref<8xf32, #tpu.memory_space<smem>>
    %162 = vector.broadcast %161 : f32 to vector<2x128xf32>
    %163 = arith.addf %160, %162 : vector<2x128xf32>
    %cst_34 = arith.constant 0.000000e+00 : f32
    %164 = vector.broadcast %cst_34 : f32 to vector<2x128xf32>
    %165 = arith.cmpf oge, %163, %164 : vector<2x128xf32>
    %cst_35 = arith.constant 1.000000e-01 : f32
    %166 = vector.broadcast %cst_35 : f32 to vector<2x128xf32>
    %167 = arith.mulf %166, %163 : vector<2x128xf32>
    %168 = arith.select %165, %163, %167 : vector<2x128xi1>, vector<2x128xf32>
    %c28 = arith.constant 28 : index
    %169 = memref.load %arg4[%c28] : memref<32xf32, #tpu.memory_space<smem>>
    %170 = vector.broadcast %169 : f32 to vector<2x128xf32>
    %171 = arith.mulf %1, %170 : vector<2x128xf32>
    %c29 = arith.constant 29 : index
    %172 = memref.load %arg4[%c29] : memref<32xf32, #tpu.memory_space<smem>>
    %173 = vector.broadcast %172 : f32 to vector<2x128xf32>
    %174 = arith.mulf %3, %173 : vector<2x128xf32>
    %175 = arith.addf %171, %174 : vector<2x128xf32>
    %c30 = arith.constant 30 : index
    %176 = memref.load %arg4[%c30] : memref<32xf32, #tpu.memory_space<smem>>
    %177 = vector.broadcast %176 : f32 to vector<2x128xf32>
    %178 = arith.mulf %5, %177 : vector<2x128xf32>
    %179 = arith.addf %175, %178 : vector<2x128xf32>
    %c31 = arith.constant 31 : index
    %180 = memref.load %arg4[%c31] : memref<32xf32, #tpu.memory_space<smem>>
    %181 = vector.broadcast %180 : f32 to vector<2x128xf32>
    %182 = arith.mulf %7, %181 : vector<2x128xf32>
    %183 = arith.addf %179, %182 : vector<2x128xf32>
    %c7_36 = arith.constant 7 : index
    %184 = memref.load %arg5[%c7_36] : memref<8xf32, #tpu.memory_space<smem>>
    %185 = vector.broadcast %184 : f32 to vector<2x128xf32>
    %186 = arith.addf %183, %185 : vector<2x128xf32>
    %cst_37 = arith.constant 0.000000e+00 : f32
    %187 = vector.broadcast %cst_37 : f32 to vector<2x128xf32>
    %188 = arith.cmpf oge, %186, %187 : vector<2x128xf32>
    %cst_38 = arith.constant 1.000000e-01 : f32
    %189 = vector.broadcast %cst_38 : f32 to vector<2x128xf32>
    %190 = arith.mulf %189, %186 : vector<2x128xf32>
    %191 = arith.select %188, %186, %190 : vector<2x128xi1>, vector<2x128xf32>
    %c0_39 = arith.constant 0 : index
    %192 = memref.load %arg6[%c0_39] : memref<32xf32, #tpu.memory_space<smem>>
    %193 = vector.broadcast %192 : f32 to vector<2x128xf32>
    %194 = arith.mulf %30, %193 : vector<2x128xf32>
    %c1_40 = arith.constant 1 : index
    %195 = memref.load %arg6[%c1_40] : memref<32xf32, #tpu.memory_space<smem>>
    %196 = vector.broadcast %195 : f32 to vector<2x128xf32>
    %197 = arith.mulf %53, %196 : vector<2x128xf32>
    %198 = arith.addf %194, %197 : vector<2x128xf32>
    %c2_41 = arith.constant 2 : index
    %199 = memref.load %arg6[%c2_41] : memref<32xf32, #tpu.memory_space<smem>>
    %200 = vector.broadcast %199 : f32 to vector<2x128xf32>
    %201 = arith.mulf %76, %200 : vector<2x128xf32>
    %202 = arith.addf %198, %201 : vector<2x128xf32>
    %c3_42 = arith.constant 3 : index
    %203 = memref.load %arg6[%c3_42] : memref<32xf32, #tpu.memory_space<smem>>
    %204 = vector.broadcast %203 : f32 to vector<2x128xf32>
    %205 = arith.mulf %99, %204 : vector<2x128xf32>
    %206 = arith.addf %202, %205 : vector<2x128xf32>
    %c0_43 = arith.constant 0 : index
    %207 = memref.load %arg7[%c0_43] : memref<8xf32, #tpu.memory_space<smem>>
    %208 = vector.broadcast %207 : f32 to vector<2x128xf32>
    %209 = arith.addf %206, %208 : vector<2x128xf32>
    %c16_44 = arith.constant 16 : index
    %210 = memref.load %arg6[%c16_44] : memref<32xf32, #tpu.memory_space<smem>>
    %211 = vector.broadcast %210 : f32 to vector<2x128xf32>
    %212 = arith.mulf %122, %211 : vector<2x128xf32>
    %c17_45 = arith.constant 17 : index
    %213 = memref.load %arg6[%c17_45] : memref<32xf32, #tpu.memory_space<smem>>
    %214 = vector.broadcast %213 : f32 to vector<2x128xf32>
    %215 = arith.mulf %145, %214 : vector<2x128xf32>
    %216 = arith.addf %212, %215 : vector<2x128xf32>
    %c18_46 = arith.constant 18 : index
    %217 = memref.load %arg6[%c18_46] : memref<32xf32, #tpu.memory_space<smem>>
    %218 = vector.broadcast %217 : f32 to vector<2x128xf32>
    %219 = arith.mulf %168, %218 : vector<2x128xf32>
    %220 = arith.addf %216, %219 : vector<2x128xf32>
    %c19_47 = arith.constant 19 : index
    %221 = memref.load %arg6[%c19_47] : memref<32xf32, #tpu.memory_space<smem>>
    %222 = vector.broadcast %221 : f32 to vector<2x128xf32>
    %223 = arith.mulf %191, %222 : vector<2x128xf32>
    %224 = arith.addf %220, %223 : vector<2x128xf32>
    %c4_48 = arith.constant 4 : index
    %225 = memref.load %arg7[%c4_48] : memref<8xf32, #tpu.memory_space<smem>>
    %226 = vector.broadcast %225 : f32 to vector<2x128xf32>
    %227 = arith.addf %224, %226 : vector<2x128xf32>
    %c0_49 = arith.constant 0 : index
    %c0_50 = arith.constant 0 : index
    %c0_51 = arith.constant 0 : index
    %c0_52 = arith.constant 0 : index
    %228 = vector.load %arg2[%c0_49, %c0_50, %c0_51, %c0_52] : memref<1x4x2x128xf32, #tpu.memory_space<vmem>>, vector<1x1x2x128xf32>
    %229 = vector.shape_cast %228 : vector<1x1x2x128xf32> to vector<2x128xf32>
    %230 = arith.mulf %229, %209 : vector<2x128xf32>
    %231 = arith.addf %230, %227 : vector<2x128xf32>
    %c0_53 = arith.constant 0 : index
    %c0_54 = arith.constant 0 : index
    %c0_55 = arith.constant 0 : index
    %c0_56 = arith.constant 0 : index
    %232 = vector.load %arg8[%c0_53, %c0_54, %c0_55, %c0_56] : memref<1x4x2x128xf32, #tpu.memory_space<vmem>>, vector<1x1x2x128xf32>
    %233 = vector.shape_cast %232 : vector<1x1x2x128xf32> to vector<2x128xf32>
    %234 = vector.shape_cast %231 : vector<2x128xf32> to vector<1x1x2x128xf32>
    tpu.vector_store %arg8[%c0_53, %c0_54, %c0_55, %c0_56], %234 {strides = array<i32>} : memref<1x4x2x128xf32, #tpu.memory_space<vmem>>, vector<1x1x2x128xf32>,
    %c4_57 = arith.constant 4 : index
    %235 = memref.load %arg6[%c4_57] : memref<32xf32, #tpu.memory_space<smem>>
    %236 = vector.broadcast %235 : f32 to vector<2x128xf32>
    %237 = arith.mulf %30, %236 : vector<2x128xf32>
    %c5_58 = arith.constant 5 : index
    %238 = memref.load %arg6[%c5_58] : memref<32xf32, #tpu.memory_space<smem>>
    %239 = vector.broadcast %238 : f32 to vector<2x128xf32>
    %240 = arith.mulf %53, %239 : vector<2x128xf32>
    %241 = arith.addf %237, %240 : vector<2x128xf32>
    %c6_59 = arith.constant 6 : index
    %242 = memref.load %arg6[%c6_59] : memref<32xf32, #tpu.memory_space<smem>>
    %243 = vector.broadcast %242 : f32 to vector<2x128xf32>
    %244 = arith.mulf %76, %243 : vector<2x128xf32>
    %245 = arith.addf %241, %244 : vector<2x128xf32>
    %c7_60 = arith.constant 7 : index
    %246 = memref.load %arg6[%c7_60] : memref<32xf32, #tpu.memory_space<smem>>
    %247 = vector.broadcast %246 : f32 to vector<2x128xf32>
    %248 = arith.mulf %99, %247 : vector<2x128xf32>
    %249 = arith.addf %245, %248 : vector<2x128xf32>
    %c1_61 = arith.constant 1 : index
    %250 = memref.load %arg7[%c1_61] : memref<8xf32, #tpu.memory_space<smem>>
    %251 = vector.broadcast %250 : f32 to vector<2x128xf32>
    %252 = arith.addf %249, %251 : vector<2x128xf32>
    %c20_62 = arith.constant 20 : index
    %253 = memref.load %arg6[%c20_62] : memref<32xf32, #tpu.memory_space<smem>>
    %254 = vector.broadcast %253 : f32 to vector<2x128xf32>
    %255 = arith.mulf %122, %254 : vector<2x128xf32>
    %c21_63 = arith.constant 21 : index
    %256 = memref.load %arg6[%c21_63] : memref<32xf32, #tpu.memory_space<smem>>
    %257 = vector.broadcast %256 : f32 to vector<2x128xf32>
    %258 = arith.mulf %145, %257 : vector<2x128xf32>
    %259 = arith.addf %255, %258 : vector<2x128xf32>
    %c22_64 = arith.constant 22 : index
    %260 = memref.load %arg6[%c22_64] : memref<32xf32, #tpu.memory_space<smem>>
    %261 = vector.broadcast %260 : f32 to vector<2x128xf32>
    %262 = arith.mulf %168, %261 : vector<2x128xf32>
    %263 = arith.addf %259, %262 : vector<2x128xf32>
    %c23_65 = arith.constant 23 : index
    %264 = memref.load %arg6[%c23_65] : memref<32xf32, #tpu.memory_space<smem>>
    %265 = vector.broadcast %264 : f32 to vector<2x128xf32>
    %266 = arith.mulf %191, %265 : vector<2x128xf32>
    %267 = arith.addf %263, %266 : vector<2x128xf32>
    %c5_66 = arith.constant 5 : index
    %268 = memref.load %arg7[%c5_66] : memref<8xf32, #tpu.memory_space<smem>>
    %269 = vector.broadcast %268 : f32 to vector<2x128xf32>
    %270 = arith.addf %267, %269 : vector<2x128xf32>
    %c0_67 = arith.constant 0 : index
    %c1_68 = arith.constant 1 : index
    %c0_69 = arith.constant 0 : index
    %c0_70 = arith.constant 0 : index
    %271 = vector.load %arg2[%c0_67, %c1_68, %c0_69, %c0_70] : memref<1x4x2x128xf32, #tpu.memory_space<vmem>>, vector<1x1x2x128xf32>
    %272 = vector.shape_cast %271 : vector<1x1x2x128xf32> to vector<2x128xf32>
    %273 = arith.mulf %272, %252 : vector<2x128xf32>
    %274 = arith.addf %273, %270 : vector<2x128xf32>
    %c0_71 = arith.constant 0 : index
    %c1_72 = arith.constant 1 : index
    %c0_73 = arith.constant 0 : index
    %c0_74 = arith.constant 0 : index
    %275 = vector.load %arg8[%c0_71, %c1_72, %c0_73, %c0_74] : memref<1x4x2x128xf32, #tpu.memory_space<vmem>>, vector<1x1x2x128xf32>
    %276 = vector.shape_cast %275 : vector<1x1x2x128xf32> to vector<2x128xf32>
    %277 = vector.shape_cast %274 : vector<2x128xf32> to vector<1x1x2x128xf32>
    tpu.vector_store %arg8[%c0_71, %c1_72, %c0_73, %c0_74], %277 {strides = array<i32>} : memref<1x4x2x128xf32, #tpu.memory_space<vmem>>, vector<1x1x2x128xf32>,
    %c8_75 = arith.constant 8 : index
    %278 = memref.load %arg6[%c8_75] : memref<32xf32, #tpu.memory_space<smem>>
    %279 = vector.broadcast %278 : f32 to vector<2x128xf32>
    %280 = arith.mulf %30, %279 : vector<2x128xf32>
    %c9_76 = arith.constant 9 : index
    %281 = memref.load %arg6[%c9_76] : memref<32xf32, #tpu.memory_space<smem>>
    %282 = vector.broadcast %281 : f32 to vector<2x128xf32>
    %283 = arith.mulf %53, %282 : vector<2x128xf32>
    %284 = arith.addf %280, %283 : vector<2x128xf32>
    %c10_77 = arith.constant 10 : index
    %285 = memref.load %arg6[%c10_77] : memref<32xf32, #tpu.memory_space<smem>>
    %286 = vector.broadcast %285 : f32 to vector<2x128xf32>
    %287 = arith.mulf %76, %286 : vector<2x128xf32>
    %288 = arith.addf %284, %287 : vector<2x128xf32>
    %c11_78 = arith.constant 11 : index
    %289 = memref.load %arg6[%c11_78] : memref<32xf32, #tpu.memory_space<smem>>
    %290 = vector.broadcast %289 : f32 to vector<2x128xf32>
    %291 = arith.mulf %99, %290 : vector<2x128xf32>
    %292 = arith.addf %288, %291 : vector<2x128xf32>
    %c2_79 = arith.constant 2 : index
    %293 = memref.load %arg7[%c2_79] : memref<8xf32, #tpu.memory_space<smem>>
    %294 = vector.broadcast %293 : f32 to vector<2x128xf32>
    %295 = arith.addf %292, %294 : vector<2x128xf32>
    %c24_80 = arith.constant 24 : index
    %296 = memref.load %arg6[%c24_80] : memref<32xf32, #tpu.memory_space<smem>>
    %297 = vector.broadcast %296 : f32 to vector<2x128xf32>
    %298 = arith.mulf %122, %297 : vector<2x128xf32>
    %c25_81 = arith.constant 25 : index
    %299 = memref.load %arg6[%c25_81] : memref<32xf32, #tpu.memory_space<smem>>
    %300 = vector.broadcast %299 : f32 to vector<2x128xf32>
    %301 = arith.mulf %145, %300 : vector<2x128xf32>
    %302 = arith.addf %298, %301 : vector<2x128xf32>
    %c26_82 = arith.constant 26 : index
    %303 = memref.load %arg6[%c26_82] : memref<32xf32, #tpu.memory_space<smem>>
    %304 = vector.broadcast %303 : f32 to vector<2x128xf32>
    %305 = arith.mulf %168, %304 : vector<2x128xf32>
    %306 = arith.addf %302, %305 : vector<2x128xf32>
    %c27_83 = arith.constant 27 : index
    %307 = memref.load %arg6[%c27_83] : memref<32xf32, #tpu.memory_space<smem>>
    %308 = vector.broadcast %307 : f32 to vector<2x128xf32>
    %309 = arith.mulf %191, %308 : vector<2x128xf32>
    %310 = arith.addf %306, %309 : vector<2x128xf32>
    %c6_84 = arith.constant 6 : index
    %311 = memref.load %arg7[%c6_84] : memref<8xf32, #tpu.memory_space<smem>>
    %312 = vector.broadcast %311 : f32 to vector<2x128xf32>
    %313 = arith.addf %310, %312 : vector<2x128xf32>
    %c0_85 = arith.constant 0 : index
    %c2_86 = arith.constant 2 : index
    %c0_87 = arith.constant 0 : index
    %c0_88 = arith.constant 0 : index
    %314 = vector.load %arg2[%c0_85, %c2_86, %c0_87, %c0_88] : memref<1x4x2x128xf32, #tpu.memory_space<vmem>>, vector<1x1x2x128xf32>
    %315 = vector.shape_cast %314 : vector<1x1x2x128xf32> to vector<2x128xf32>
    %316 = arith.mulf %315, %295 : vector<2x128xf32>
    %317 = arith.addf %316, %313 : vector<2x128xf32>
    %c0_89 = arith.constant 0 : index
    %c2_90 = arith.constant 2 : index
    %c0_91 = arith.constant 0 : index
    %c0_92 = arith.constant 0 : index
    %318 = vector.load %arg8[%c0_89, %c2_90, %c0_91, %c0_92] : memref<1x4x2x128xf32, #tpu.memory_space<vmem>>, vector<1x1x2x128xf32>
    %319 = vector.shape_cast %318 : vector<1x1x2x128xf32> to vector<2x128xf32>
    %320 = vector.shape_cast %317 : vector<2x128xf32> to vector<1x1x2x128xf32>
    tpu.vector_store %arg8[%c0_89, %c2_90, %c0_91, %c0_92], %320 {strides = array<i32>} : memref<1x4x2x128xf32, #tpu.memory_space<vmem>>, vector<1x1x2x128xf32>,
    %c12_93 = arith.constant 12 : index
    %321 = memref.load %arg6[%c12_93] : memref<32xf32, #tpu.memory_space<smem>>
    %322 = vector.broadcast %321 : f32 to vector<2x128xf32>
    %323 = arith.mulf %30, %322 : vector<2x128xf32>
    %c13_94 = arith.constant 13 : index
    %324 = memref.load %arg6[%c13_94] : memref<32xf32, #tpu.memory_space<smem>>
    %325 = vector.broadcast %324 : f32 to vector<2x128xf32>
    %326 = arith.mulf %53, %325 : vector<2x128xf32>
    %327 = arith.addf %323, %326 : vector<2x128xf32>
    %c14_95 = arith.constant 14 : index
    %328 = memref.load %arg6[%c14_95] : memref<32xf32, #tpu.memory_space<smem>>
    %329 = vector.broadcast %328 : f32 to vector<2x128xf32>
    %330 = arith.mulf %76, %329 : vector<2x128xf32>
    %331 = arith.addf %327, %330 : vector<2x128xf32>
    %c15_96 = arith.constant 15 : index
    %332 = memref.load %arg6[%c15_96] : memref<32xf32, #tpu.memory_space<smem>>
    %333 = vector.broadcast %332 : f32 to vector<2x128xf32>
    %334 = arith.mulf %99, %333 : vector<2x128xf32>
    %335 = arith.addf %331, %334 : vector<2x128xf32>
    %c3_97 = arith.constant 3 : index
    %336 = memref.load %arg7[%c3_97] : memref<8xf32, #tpu.memory_space<smem>>
    %337 = vector.broadcast %336 : f32 to vector<2x128xf32>
    %338 = arith.addf %335, %337 : vector<2x128xf32>
    %c28_98 = arith.constant 28 : index
    %339 = memref.load %arg6[%c28_98] : memref<32xf32, #tpu.memory_space<smem>>
    %340 = vector.broadcast %339 : f32 to vector<2x128xf32>
    %341 = arith.mulf %122, %340 : vector<2x128xf32>
    %c29_99 = arith.constant 29 : index
    %342 = memref.load %arg6[%c29_99] : memref<32xf32, #tpu.memory_space<smem>>
    %343 = vector.broadcast %342 : f32 to vector<2x128xf32>
    %344 = arith.mulf %145, %343 : vector<2x128xf32>
    %345 = arith.addf %341, %344 : vector<2x128xf32>
    %c30_100 = arith.constant 30 : index
    %346 = memref.load %arg6[%c30_100] : memref<32xf32, #tpu.memory_space<smem>>
    %347 = vector.broadcast %346 : f32 to vector<2x128xf32>
    %348 = arith.mulf %168, %347 : vector<2x128xf32>
    %349 = arith.addf %345, %348 : vector<2x128xf32>
    %c31_101 = arith.constant 31 : index
    %350 = memref.load %arg6[%c31_101] : memref<32xf32, #tpu.memory_space<smem>>
    %351 = vector.broadcast %350 : f32 to vector<2x128xf32>
    %352 = arith.mulf %191, %351 : vector<2x128xf32>
    %353 = arith.addf %349, %352 : vector<2x128xf32>
    %c7_102 = arith.constant 7 : index
    %354 = memref.load %arg7[%c7_102] : memref<8xf32, #tpu.memory_space<smem>>
    %355 = vector.broadcast %354 : f32 to vector<2x128xf32>
    %356 = arith.addf %353, %355 : vector<2x128xf32>
    %c0_103 = arith.constant 0 : index
    %c3_104 = arith.constant 3 : index
    %c0_105 = arith.constant 0 : index
    %c0_106 = arith.constant 0 : index
    %357 = vector.load %arg2[%c0_103, %c3_104, %c0_105, %c0_106] : memref<1x4x2x128xf32, #tpu.memory_space<vmem>>, vector<1x1x2x128xf32>
    %358 = vector.shape_cast %357 : vector<1x1x2x128xf32> to vector<2x128xf32>
    %359 = arith.mulf %358, %338 : vector<2x128xf32>
    %360 = arith.addf %359, %356 : vector<2x128xf32>
    %c0_107 = arith.constant 0 : index
    %c3_108 = arith.constant 3 : index
    %c0_109 = arith.constant 0 : index
    %c0_110 = arith.constant 0 : index
    %361 = vector.load %arg8[%c0_107, %c3_108, %c0_109, %c0_110] : memref<1x4x2x128xf32, #tpu.memory_space<vmem>>, vector<1x1x2x128xf32>
    %362 = vector.shape_cast %361 : vector<1x1x2x128xf32> to vector<2x128xf32>
    %363 = vector.shape_cast %360 : vector<2x128xf32> to vector<1x1x2x128xf32>
    tpu.vector_store %arg8[%c0_107, %c3_108, %c0_109, %c0_110], %363 {strides = array<i32>} : memref<1x4x2x128xf32, #tpu.memory_space<vmem>>, vector<1x1x2x128xf32>,
    return
  }
  func.func @transform_0(%arg0: i32, %arg1: i32) -> (i32, i32, i32, i32) {
    %c0_i32 = arith.constant 0 : i32
    %c0_i32_0 = arith.constant 0 : i32
    %c0_i32_1 = arith.constant 0 : i32
    return %arg0, %c0_i32, %arg1, %c0_i32_0 : i32, i32, i32, i32
  }
  func.func @transform_1(%arg0: i32, %arg1: i32) -> (i32, i32, i32, i32) {
    %c0_i32 = arith.constant 0 : i32
    %c0_i32_0 = arith.constant 0 : i32
    %c0_i32_1 = arith.constant 0 : i32
    return %arg0, %c0_i32, %arg1, %c0_i32_0 : i32, i32, i32, i32
  }
  func.func @transform_2(%arg0: i32, %arg1: i32) -> i32 {
    %c0_i32 = arith.constant 0 : i32
    %c0_i32_0 = arith.constant 0 : i32
    return %c0_i32 : i32
  }
  func.func @transform_3(%arg0: i32, %arg1: i32) -> i32 {
    %c0_i32 = arith.constant 0 : i32
    %c0_i32_0 = arith.constant 0 : i32
    return %c0_i32 : i32
  }
  func.func @transform_4(%arg0: i32, %arg1: i32) -> i32 {
    %c0_i32 = arith.constant 0 : i32
    %c0_i32_0 = arith.constant 0 : i32
    return %c0_i32 : i32
  }
  func.func @transform_5(%arg0: i32, %arg1: i32) -> i32 {
    %c0_i32 = arith.constant 0 : i32
    %c0_i32_0 = arith.constant 0 : i32
    return %c0_i32 : i32
  }
  func.func @transform_6(%arg0: i32, %arg1: i32) -> (i32, i32, i32, i32) {
    %c0_i32 = arith.constant 0 : i32
    %c0_i32_0 = arith.constant 0 : i32
    %c0_i32_1 = arith.constant 0 : i32
    return %arg0, %c0_i32, %arg1, %c0_i32_0 : i32, i32, i32, i32
  }
}

</mosaic_0001>

<bundles_post_ra>
// kernel: tpu_custom_call.1
= control target key start
LH: loop header
LB: loop body
LE: loop exit
PB: predicated region body
PF: predicated region fallthrough
CT: control target
= control target key end

     0   :  { %s1854_s0 = inlined_call_operand.hbm [shape: f32[2,4,2,128], index: 0, kind: input, shape index: {}]   ;;  %s1855_s1 = inlined_call_operand.hbm [shape: f32[2,4,2,128], index: 1, kind: input, shape index: {}]   ;;  %s1856_s2 = inlined_call_operand.vmem [shape: f32[32], index: 2, kind: input, shape index: {}]   ;;  %s1857_s3 = inlined_call_operand.vmem [shape: f32[8], index: 3, kind: input, shape index: {}]   ;;  %s1858_s4 = inlined_call_operand.vmem [shape: f32[32], index: 4, kind: input, shape index: {}]   ;;  %s1859_s5 = inlined_call_operand.vmem [shape: f32[8], index: 5, kind: input, shape index: {}]   ;;  %s1860_s6 = inlined_call_operand.hbm [shape: f32[2,4,2,128], index: 6, kind: output, shape index: {}]  }
   0x1   :  { %1868 = sst [smem:[#allocation23_spill]] %s1854_s0 }
   0x2   :  { %1869 = sst [smem:[#allocation24_spill]] %s1856_s2 }
   0x3   :  { %1870 = sst [smem:[#allocation25_spill]] %s1857_s3 }
   0x4   :  { %1871 = sst [smem:[#allocation26_spill]] %s1858_s4 }
   0x5   :  { %1872 = sst [smem:[#allocation27_spill]] %s1859_s5 }
   0x6   :  { %11 = vsyncpa [#allocation3], 0 }
   0x7   :  { %13 = vsyncpa [#allocation3 + $0x1], 0 }
   0x8   :  { %14 = vsyncpa [#allocation7], 0 }
   0x9   :  { %16 = vsyncpa [#allocation7 + $0x1], 0 }
   0xa   :  { %17 = vsyncpa [#allocation5], 0 }
   0xb   :  { %18 = vsyncpa [#allocation10], 0 }
   0xc   :  { %19 = vsyncpa [#allocation13], 0 }
   0xd   :  { %20 = vsyncpa [#allocation4], 0 }
   0xe   :  { %22 = vsyncpa [#allocation4 + $0x1], 0  ;;  %s1376_s21 = smov 0   ;;  %s1378_s22 = smov 0  }
   0xf   :  { %s1380_s23 = smov 0   ;;  %s1382_s24 = smov 0  }
  0x10   :  { %s1384_s25 = smov 0   ;;  %s1386_s26 = smov 0  }
  0x11 LB: > { %s889_s27 = sadd.s32 4294967295, %s1328_s26   ;;  %s890_s28 = sadd.s32 4294967294, %s1328_s26   ;;  %s1328_s26 = sphi %s1386_s26, %s28_s26   ;;  %s1324_s25 = sphi %s1384_s25, %s1902_s25   ;;  %s1320_s24 = sphi %s1382_s24, %s1901_s24   ;;  %s1316_s23 = sphi %s1380_s23, %s1900_s23   ;;  %s1312_s22 = sphi %s1378_s22, %s1899_s22   ;;  %s1308_s21 = sphi %s1376_s21, %s1898_s21  }
  0x12   : > { %p62_p0 = scmp.ne.s32.totalorder %s1312_s22, %s1308_s21  ;;  %p1410_p1 = scmp.eq.s32.totalorder %s889_s27, 0 }
  0x13   : > { %p1414_p2 = scmp.eq.s32.totalorder %s889_s27, 1  ;;  %p206_p3 = scmp.eq.s32.totalorder %s890_s28, 1 }
  0x14   : > { %s1873_s29 = scalar_select %p1410_p1, 1, 0 }
  0x15   : > { %s1874_s30 = scalar_select %p1414_p2, 1, 0 }
  0x16   : > { %p1420_p4 = por %p1410_p1, %p62_p0  ;;  %p891_p5 = scmp.ge.s32.totalorder %s1328_s26, 1 }
  0x17   : > { %p1425_p6 = por %p206_p3, %p62_p0  ;;  %p213_p7 = scmp.lt.s32.totalorder %s1328_s26, 3 }
  0x18   : > { %s1875_s7 = scalar_select %p1420_p4, 1, 0 }
  0x19   : > { %s1876_s8 = scalar_select %p1425_p6, 1, 0 }
  0x1a   : > { %s1877_s3 = sld [smem:[#allocation25_spill]]  ;;  %p1433_p8 = pnand %p891_p5, %p213_p7 }
  0x1b   : > { %s1879_s2 = sld [smem:[#allocation24_spill]] }
  0x1c   : > { %s1878_s12 = scalar_select %p1433_p8, 1, 0 }
  0x1d   : > { %p1026_p10 = pneg %p1433_p8  ;;  %s1881_s4 = sld [smem:[#allocation26_spill]] }
  0x1f   : > { %p1445_p11 = pnand %p1026_p10, %p1410_p1 }
  0x20   : > { %s237_s11 = sshll.u32 %s1877_s3, 4  ;;  %s238_s11 = int_to_ptr.vmem [resolvable:$true] %s237_s11 }
  0x21   : > { %s226_s15 = sshll.u32 %s1879_s2, 4  ;;  %s1116_s20 = scalar_lea.vmem %s238_s11, 16  ;;  %s227_s15 = int_to_ptr.vmem [resolvable:$true] %s226_s15 }
  0x22   : > { %p1117_p12 = scmp.ne.s32.totalorder %s238_s11, %s1116_s20  ;;  %p1118_p13 = pneg %p1445_p11 }
  0x23   : > { %s248_s19 = sshll.u32 %s1881_s4, 4  ;;  %p1124_p5 = scmp.lt.s32.totalorder %s238_s11, %s238_s11  ;;  %s1452_s19 = int_to_ptr.vmem [resolvable:$true] %s248_s19 }
  0x24   : > { %p1119_p0 = pnand %p1118_p13, %p1117_p12  ;;  %p1125_p7 = scmp.lt.s32.totalorder %s1116_s20, %s1116_s20 }
  0x26   : > { %p1120_p3 = pneg %p1119_p0  ;;  %p1126_p10 = por %p1125_p7, %p1124_p5 }
  0x28   : > { %p1127_p9 = pnand %p1126_p10, %p1120_p3 }
  0x2a   : > { %1130 = shalt.err (!%p1127_p9)
}
  0x2b   : > { %s1330_s27 = smov [#allocation9]   ;;  %s1131_s28 = scalar_lea.vmem %s227_s15, 16 }
  0x2c   : > { %1032 = dma.vmem_to_smem (!%p1445_p11), %s238_s11, 16, %s1330_s27, [#allocation10]  }
  0x2d   : > { %p1132_p6 = scmp.ne.s32.totalorder %s227_s15, %s1131_s28  ;;  %p1139_p8 = scmp.lt.s32.totalorder %s227_s15, %s227_s15 }
  0x2e   : > { %p1140_p2 = scmp.lt.s32.totalorder %s1131_s28, %s1131_s28 }
  0x2f   : > { %p1134_p1 = pnand %p1132_p6, %p1118_p13 }
  0x30   : > { %p1141_p12 = por %p1140_p2, %p1139_p8 }
  0x31   : > { %p1135_p4 = pneg %p1134_p1 }
  0x33   : > { %p1142_p0 = pnand %p1141_p12, %p1135_p4 }
  0x35   : > { %1145 = shalt.err (!%p1142_p0)
}
  0x36   : > { %s1331_s9 = smov [#allocation8]   ;;  %s1882_s5 = sld [smem:[#allocation27_spill]] }
  0x37   : > { %1029 = dma.vmem_to_smem (!%p1445_p11), %s227_s15, 16, %s1331_s9, [#allocation5]  }
  0x38   : > { %s1146_s14 = scalar_lea.vmem %s1452_s19, 16  ;;  %p1154_p4 = scmp.lt.s32.totalorder %s1452_s19, %s1452_s19 }
  0x39   : > { %p1147_p6 = scmp.ne.s32.totalorder %s1452_s19, %s1146_s14  ;;  %p1155_p8 = scmp.lt.s32.totalorder %s1146_s14, %s1146_s14 }
  0x3b   : > { %p1149_p1 = pnand %p1147_p6, %p1118_p13  ;;  %p1156_p9 = por %p1155_p8, %p1154_p4 }
  0x3c   : > { %s259_s13 = sshll.u32 %s1882_s5, 4  ;;  %s260_s13 = int_to_ptr.vmem [resolvable:$true] %s259_s13 }
  0x3d   : > { %p1150_p2 = pneg %p1149_p1 }
  0x3f   : > { %p1157_p3 = pnand %p1156_p9, %p1150_p2 }
  0x41   : > { %1160 = shalt.err (!%p1157_p3)
}
  0x42   : > { %s1332_s17 = smov [#allocation11]   ;;  %s1161_s15 = scalar_lea.vmem %s260_s13, 16 }
  0x43   : > { %1035 = dma.vmem_to_smem (!%p1445_p11), %s1452_s19, 16, %s1332_s17, [#allocation10]  }
  0x44   : > { %p1162_p5 = scmp.ne.s32.totalorder %s260_s13, %s1161_s15  ;;  %p1169_p12 = scmp.lt.s32.totalorder %s260_s13, %s260_s13 }
  0x45   : > { %p1170_p0 = scmp.lt.s32.totalorder %s1161_s15, %s1161_s15 }
  0x46   : > { %p1164_p7 = pnand %p1162_p5, %p1118_p13 }
  0x47   : > { %p1171_p6 = por %p1170_p0, %p1169_p12 }
  0x48   : > { %p1165_p10 = pneg %p1164_p7 }
  0x4a   : > { %p1172_p1 = pnand %p1171_p6, %p1165_p10 }
  0x4c   : > { %1175 = shalt.err (!%p1172_p1)
}
  0x4d   : > { %s1333_s18 = smov [#allocation12]   ;;  %s40_s19 = sadd.s32 1, %s1324_s25 }
  0x4e   : > { %1038 = dma.vmem_to_smem (!%p1445_p11), %s260_s13, 16, %s1333_s18, [#allocation13]  }
  0x4f   : > { %s49_s20 = sadd.s32 1, %s1316_s23  ;;  %p42_p13 = scmp.ge.s32.totalorder %s40_s19, 2 }
  0x50   : > { %p56_p2 = scmp.ne.s32.totalorder %s1316_s23, %s1312_s22  ;;  %p57_p4 = scmp.eq.s32.totalorder %s1328_s26, 0 }
  0x51   : > { %p1054_p8 = scmp.lt.s32.totalorder %s1328_s26, 2  ;;  %s1904_s19 = smov (%p42_p13, %s40_s19), 0 }
  0x52   : > { %1883 = sst [smem:[#allocation21_spill]] %s1904_s19  ;;  %p58_p9 = por %p57_p4, %p56_p2 }
  0x53   : > { %p1884_p3 = scmp.ne.s32.totalorder %s1874_s30, 0  ;;  %s44_s27 = ssub.s32 %s1324_s25, %s1904_s19 }
  0x54   : > { %s1501_s28 = sand.u32 1, %s1316_s23   ;;  %p47_p11 = scmp.eq.s32.totalorder %s44_s27, 0 }
  0x55   : > { %p1494_p5 = por %p1884_p3, %p56_p2  ;;  %s1865_s9 = sshll.u32 %s1501_s28, 3 }
  0x56   : > { %s1866_s10 = sshll.u32 %s1324_s25, 7  ;;  %s1887_s0 = sld [smem:[#allocation23_spill]] }
  0x57   : > { %s1506_s11 = scalar_select %p47_p11, %s1316_s23, %s49_s20  }
  0x58   : > { %s274_s17 = scalar_lea.vmem [#allocation2], %s1865_s9  ;;  %p1517_p7 = pnand %p1054_p8, %p58_p9 }
  0x59   : > { %1886 = sst [smem:[#allocation22_spill]] %s1506_s11  ;;  %s282_s15 = sshll.u32 %s274_s17, 4  ;;  %s283_s15 = int_to_ptr.vmem [resolvable:$true] %s282_s15 }
  0x5a   : > { %s271_s27 = scalar_lea.sflag [#allocation3], %s1501_s28  ;;  %p1178_p10 = pneg %p1517_p7 }
  0x5b   : > { %s1189_s20 = scalar_lea.vmem %s283_s15, 128  ;;  %s1334_s13 = smov [#allocation2]  }
  0x5c   : > { %s281_s30 = scalar_lea.hbm %s1887_s0, %s1866_s10  ;;  %p1190_p12 = scmp.ne.s32.totalorder %s283_s15, %s1189_s20 }
  0x5d   : > { %s1194_s14 = sshll.u32 %s1334_s13, 4  ;;  %s1195_s14 = int_to_ptr.vmem [resolvable:$false] %s1194_s14 }
  0x5e   : > { %p1192_p0 = pnand %p1190_p12, %p1178_p10  ;;  %s1196_s17 = scalar_lea.vmem %s1195_s14, 256 }
  0x5f   : > { %p1197_p1 = scmp.lt.s32.totalorder %s283_s15, %s1195_s14  ;;  %p1198_p13 = scmp.lt.s32.totalorder %s1196_s17, %s1189_s20 }
  0x60   : > { %p1193_p6 = pneg %p1192_p0 }
  0x61   : > { %p1199_p2 = por %p1198_p13, %p1197_p1 }
  0x63   : > { %p1200_p4 = pnand %p1199_p2, %p1193_p6 }
  0x65   : > { %1203 = shalt.err (!%p1200_p4)
}
  0x66   : > { %s1335_s9 = smov 32   ;;  %s1336_s10 = smov 2  }
  0x67   : > { %1042 = dma.hbm_to_vmem [thread:$0]  (!%p1517_p7), %s281_s30, 128, %s283_s15, %s271_s27, %s1335_s9, %s1335_s9, %s1336_s10  }
  0x68   : > { %s1889_s0 = sshll.u32 %s1324_s25, 7  ;;  %s1890_s4 = sshll.u32 %s1501_s28, 3 }
  0x69   : > { %s303_s13 = scalar_lea.hbm %s1855_s1, %s1889_s0  ;;  %s296_s14 = scalar_lea.vmem [#allocation6], %s1890_s4 }
  0x6a   : > { %s304_s20 = sshll.u32 %s296_s14, 4  ;;  %s293_s17 = scalar_lea.sflag [#allocation7], %s1501_s28  ;;  %s305_s20 = int_to_ptr.vmem [resolvable:$true] %s304_s20 }
  0x6b   : > { %s1217_s5 = scalar_lea.vmem %s305_s20, 128  ;;  %s1337_s19 = smov [#allocation6]  }
  0x6c   : > { %p1218_p8 = scmp.ne.s32.totalorder %s305_s20, %s1217_s5  ;;  %s1222_s11 = sshll.u32 %s1337_s19, 4  ;;  %s1223_s11 = int_to_ptr.vmem [resolvable:$false] %s1222_s11 }
  0x6d   : > { %s1224_s30 = scalar_lea.vmem %s1223_s11, 256  ;;  %p1225_p11 = scmp.lt.s32.totalorder %s305_s20, %s1223_s11 }
  0x6e   : > { %p1220_p9 = pnand %p1218_p8, %p1178_p10  ;;  %p1226_p12 = scmp.lt.s32.totalorder %s1224_s30, %s1217_s5 }
  0x70   : > { %p1221_p3 = pneg %p1220_p9  ;;  %p1227_p0 = por %p1226_p12, %p1225_p11 }
  0x72   : > { %p1228_p6 = pnand %p1227_p0, %p1221_p3 }
  0x74   : > { %1231 = shalt.err (!%p1228_p6)
}
  0x75   : > { %1045 = dma.hbm_to_vmem [thread:$0]  (!%p1517_p7), %s303_s13, 128, %s305_s20, %s293_s17, %s1335_s9, %s1335_s9, %s1336_s10  }
  0x76   : > { %p1891_p1 = scmp.ne.s32.totalorder %s1878_s12, 0 }
  0x77   : > { %s1545_s0 = sand.u32 (!%p1891_p1), 1, %s1312_s22   ;;  %p1892_p10 = scmp.ne.s32.totalorder (!%p1891_p1), %s1875_s7, 0 }
  0x78   : > { %316 = sbr.rel (%p1891_p1) target bundleno = 246 (0xf6), region = 44  ;;  %s1548_s2 = sshll.u32 (!%p1891_p1), %s1545_s0, 3 }
  0x79   : > { %s319_s3 = scalar_lea.sflag (!%p1891_p1), [#allocation3], %s1545_s0  ;;  %s1552_s4 = scalar_lea.vmem (!%p1891_p1), [#allocation2], %s1548_s2 }
  0x7d   : > { %1283 = dma.done.wait (%p1892_p10), %s319_s3, 128  }
  0x7e   : > { %1285 = vsyncadd (%p1892_p10), %s319_s3, 4294967168  ;;  %s328_s5 = scalar_lea.sflag [#allocation7], %s1545_s0  ;;  %s1560_s12 = scalar_lea.vmem [#allocation6], %s1548_s2 }
  0x7f   : > { %1287 = dma.done.wait (%p1892_p10), %s328_s5, 128  }
  0x80   : > { %1289 = vsyncadd (%p1892_p10), %s328_s5, 4294967168  ;;  %p1893_p7 = scmp.ne.s32.totalorder %s1873_s29, 0 }
  0x82   : > { %1291 = dma.done.wait (%p1893_p7), [#allocation5], 16  }
  0x83   : > { %1293 = vsyncadd (%p1893_p7), [#allocation5], 4294967280 }
  0x84   : > { %1295 = dma.done.wait (%p1893_p7), [#allocation10], 32  }
  0x85   : > { %1297 = vsyncadd (%p1893_p7), [#allocation10], 4294967264 }
  0x86   : > { %1299 = dma.done.wait (%p1893_p7), [#allocation13], 16  }
  0x87   : > { %1301 = vsyncadd (%p1893_p7), [#allocation13], 4294967280 }
  0x88   : > { %352 = sfence }
  0x89   : > { %s389_s7 = sld [smem:[#allocation8]]  ;;  %v1583_v0 = vld [vmem:[%s1560_s12] sm:$0x3]  ;;  %v1586_v1 = vld [vmem:[%s1560_s12 + $0x2] sm:$0x3] }
  0x8a   : > { %s914_s19 = sld [smem:[#allocation8 + $0x1]]  ;;  %v1597_v6 = vld [vmem:[%s1560_s12 + $0x4] sm:$0x3]  ;;  %v1605_v12 = vld [vmem:[%s1560_s12 + $0x6] sm:$0x3] }
  0x8b   : > { %s915_s28 = sld [smem:[#allocation8 + $0x2]] }
  0x8c   : > { %s1578_s9 = sld [smem:[#allocation8 + $0x3]] }
  0x8d   : > { %s1580_s10 = sld [smem:[#allocation9]] }
  0x8e   : > { %s917_s11 = sld [smem:[#allocation8 + $0x4]] }
  0x8f   : > { %v390_v2 = vstv %s389_s7  ;;  %s918_s15 = sld [smem:[#allocation8 + $0x5]] }
  0x90   : > { %v393_v3 = vstv %s914_s19  ;;  %s1588_s29 = sld [smem:[#allocation8 + $0x6]]  ;;  %v391_v4 = vmul.f32 %v390_v2, %v1583_v0 }
  0x91   : > { %s1590_s18 = sld [smem:[#allocation8 + $0x7]]  ;;  %v394_v5 = vmul.f32 %v1586_v1, %v393_v3  ;;  %v397_v7 = vstv %s915_s28 }
  0x92   : > { %s1594_s27 = sld [smem:[#allocation9 + $0x1]]  ;;  %v398_v11 = vmul.f32 %v1597_v6, %v397_v7  ;;  %v401_v13 = vstv %s1578_s9 }
  0x93   : > { %s922_s13 = sld [smem:[#allocation8 + $0x8]]  ;;  %v395_v10 = vadd.f32 %v394_v5, %v391_v4  ;;  %v402_v19 = vmul.f32 %v1605_v12, %v401_v13  ;;  %v405_v28 = vstv %s1580_s10 }
  0x94   : > { %s923_s14 = sld [smem:[#allocation8 + $0x9]]  ;;  %v411_v8 = vstv %s917_s11 }
  0x95   : > { %v414_v9 = vstv %s918_s15  ;;  %s1599_s20 = sld [smem:[#allocation8 + $0xa]]  ;;  %v412_v14 = vmul.f32 %v411_v8, %v1583_v0  ;;  %v399_v18 = vadd.f32 %v398_v11, %v395_v10 }
  0x96   : > { %s1602_s17 = sld [smem:[#allocation8 + $0xb]]  ;;  %v415_v15 = vmul.f32 %v1586_v1, %v414_v9  ;;  %v418_v16 = vstv %s1588_s29 }
  0x97   : > { %s1608_s30 = sld [smem:[#allocation9 + $0x2]]  ;;  %v422_v21 = vstv %s1590_s18  ;;  %v419_v25 = vmul.f32 %v1597_v6, %v418_v16  ;;  %v403_v27 = vadd.f32 %v402_v19, %v399_v18 }
  0x98   : > { %s927_s3 = sld [smem:[#allocation8 + $0xc]]  ;;  %v416_v24 = vadd.f32 %v415_v15, %v412_v14  ;;  %v423_v29 = vmul.f32 %v1605_v12, %v422_v21  ;;  %v426_v47 = vstv %s1594_s27 }
  0x99   : > { %v432_v17 = vstv %s922_s13  ;;  %s928_s5 = sld [smem:[#allocation8 + $0xd]]  ;;  %v406_v42 = vadd.f32 %v405_v28, %v403_v27 }
  0x9a   : > { %v435_v20 = vstv %s923_s14  ;;  %s929_s7 = sld [smem:[#allocation8 + $0xe]]  ;;  %v433_v22 = vmul.f32 %v432_v17, %v1583_v0  ;;  %v420_v35 = vadd.f32 %v419_v25, %v416_v24 }
  0x9b   : > { %v436_v23 = vmul.f32 %v1586_v1, %v435_v20  ;;  %s1617_s12 = sld [smem:[#allocation8 + $0xf]]  ;;  %v439_v26 = vstv %s1599_s20  ;;  %vm407_vm0 = vcmp.ge.f32.partialorder %v406_v42, 0.0  ;;  %v408_v58 = vmul.f32 0.1, %v406_v42 }
  0x9c   : > { %s1621_s19 = sld [smem:[#allocation9 + $0x3]]  ;;  %v440_v32 = vmul.f32 %v1597_v6, %v439_v26  ;;  %v443_v36 = vstv %s1602_s17  ;;  %v424_v46 = vadd.f32 %v423_v29, %v420_v35 }
  0x9d   : > { %s932_s28 = sld [smem:[#allocation8 + $0x10]]  ;;  %v437_v31 = vadd.f32 %v436_v23, %v433_v22  ;;  %v444_v44 = vmul.f32 %v1605_v12, %v443_v36  ;;  %v447_v60 = vstv %s1608_s30  ;;  %v1664_v13 = vsel %vm407_vm0, %v406_v42, %v408_v58 }
  0x9e   : > { %v453_v30 = vstv %s927_s3  ;;  %s933_s9 = sld [smem:[#allocation8 + $0x11]]  ;;  %v427_v59 = vadd.f32 %v426_v47, %v424_v46 }
  0x9f   : > { %v454_v33 = vmul.f32 %v453_v30, %v1583_v0  ;;  %v456_v34 = vstv %s928_s5  ;;  %s934_s11 = sld [smem:[#allocation8 + $0x12]]  ;;  %v441_v43 = vadd.f32 %v440_v32, %v437_v31 }
  0xa0   : > { %v457_v37 = vmul.f32 %v1586_v1, %v456_v34  ;;  %v460_v38 = vstv %s929_s7  ;;  %s1629_s15 = sld [smem:[#allocation8 + $0x13]]  ;;  %vm428_vm1 = vcmp.ge.f32.partialorder %v427_v59, 0.0  ;;  %v429_v16 = vmul.f32 0.1, %v427_v59 }
  0xa1   : > { %v461_v39 = vmul.f32 %v1597_v6, %v460_v38  ;;  %s1632_s10 = sld [smem:[#allocation9 + $0x4]]  ;;  %v464_v41 = vstv %s1617_s12  ;;  %v445_v55 = vadd.f32 %v444_v44, %v441_v43 }
  0xa2   : > { %v458_v40 = vadd.f32 %v457_v37, %v454_v33  ;;  %s1635_s29 = sld [smem:[#allocation8 + $0x14]]  ;;  %v465_v51 = vmul.f32 %v1605_v12, %v464_v41  ;;  %v468_v63 = vstv %s1621_s19  ;;  %v1690_v34 = vsel %vm428_vm1, %v427_v59, %v429_v16 }
  0xa3   : > { %v474_v45 = vstv %s932_s28  ;;  %s938_s18 = sld [smem:[#allocation8 + $0x15]]  ;;  %v448_v9 = vadd.f32 %v447_v60, %v445_v55 }
  0xa4   : > { %v475_v48 = vmul.f32 %v474_v45, %v1583_v0  ;;  %v477_v49 = vstv %s933_s9  ;;  %s939_s13 = sld [smem:[#allocation8 + $0x16]]  ;;  %v462_v50 = vadd.f32 %v461_v39, %v458_v40 }
  0xa5   : > { %v478_v52 = vmul.f32 %v1586_v1, %v477_v49  ;;  %v481_v53 = vstv %s934_s11  ;;  %s940_s14 = sld [smem:[#allocation8 + $0x17]]  ;;  %v450_v23 = vmul.f32 0.1, %v448_v9  ;;  %vm449_vm2 = vcmp.ge.f32.partialorder %v448_v9, 0.0 }
  0xa6   : > { %v482_v54 = vmul.f32 %v1597_v6, %v481_v53  ;;  %s1643_s20 = sld [smem:[#allocation9 + $0x5]]  ;;  %v485_v57 = vstv %s1629_s15  ;;  %v466_v62 = vadd.f32 %v465_v51, %v462_v50 }
  0xa7   : > { %v479_v56 = vadd.f32 %v478_v52, %v475_v48  ;;  %s1646_s27 = sld [smem:[#allocation8 + $0x18]]  ;;  %v486_v5 = vmul.f32 %v1605_v12, %v485_v57  ;;  %v489_v24 = vstv %s1632_s10  ;;  %v1699_v41 = vsel %vm449_vm2, %v448_v9, %v450_v23  ;;  %v593_v23 = vld [vmem:[%s1552_s4] sm:$0x3] }
  0xa8   : > { %v495_v61 = vstv %s1635_s29  ;;  %s1650_s17 = sld [smem:[#allocation8 + $0x19]]  ;;  %v469_v17 = vadd.f32 %v468_v63, %v466_v62 }
  0xa9   : > { %v496_v2 = vmul.f32 %v495_v61, %v1583_v0  ;;  %v498_v3 = vstv %s938_s18  ;;  %s1654_s3 = sld [smem:[#allocation8 + $0x1a]]  ;;  %v483_v4 = vadd.f32 %v482_v54, %v479_v56 }
  0xaa   : > { %v499_v7 = vmul.f32 %v1586_v1, %v498_v3  ;;  %v502_v8 = vstv %s939_s13  ;;  %s1658_s5 = sld [smem:[#allocation8 + $0x1b]]  ;;  %v471_v31 = vmul.f32 0.1, %v469_v17  ;;  %vm470_vm3 = vcmp.ge.f32.partialorder %v469_v17, 0.0 }
  0xab   : > { %v503_v10 = vmul.f32 %v1597_v6, %v502_v8  ;;  %v506_v11 = vstv %s940_s14  ;;  %s1661_s30 = sld [smem:[#allocation9 + $0x6]]  ;;  %v487_v19 = vadd.f32 %v486_v5, %v483_v4 }
  0xac   : > { %v500_v14 = vadd.f32 %v499_v7, %v496_v2  ;;  %v507_v15 = vmul.f32 %v1605_v12, %v506_v11  ;;  %s1667_s7 = sld [smem:[#allocation8 + $0x1c]]  ;;  %v510_v28 = vstv %s1643_s20  ;;  %v1706_v45 = vsel %vm470_vm3, %v469_v17, %v471_v31 }
  0xad   : > { %v516_v18 = vstv %s1646_s27  ;;  %s1670_s12 = sld [smem:[#allocation8 + $0x1d]]  ;;  %v490_v35 = vadd.f32 %v489_v24, %v487_v19 }
  0xae   : > { %v504_v20 = vadd.f32 %v503_v10, %v500_v14  ;;  %v517_v21 = vmul.f32 %v516_v18, %v1583_v0  ;;  %v519_v22 = vstv %s1650_s17  ;;  %s1674_s19 = sld [smem:[#allocation8 + $0x1e]] }
  0xaf   : > { %v520_v25 = vmul.f32 %v1586_v1, %v519_v22  ;;  %v523_v26 = vstv %s1654_s3  ;;  %s1679_s28 = sld [smem:[#allocation8 + $0x1f]]  ;;  %vm491_vm4 = vcmp.ge.f32.partialorder %v490_v35, 0.0  ;;  %v492_v48 = vmul.f32 0.1, %v490_v35 }
  0xb0   : > { %v508_v27 = vadd.f32 %v507_v15, %v504_v20  ;;  %v524_v29 = vmul.f32 %v1597_v6, %v523_v26  ;;  %v527_v30 = vstv %s1658_s5  ;;  %s1684_s9 = sld [smem:[#allocation9 + $0x7]] }
  0xb1   : > { %v521_v32 = vadd.f32 %v520_v25, %v517_v21  ;;  %v528_v33 = vmul.f32 %v1605_v12, %v527_v30  ;;  %s1687_s11 = sld [smem:[#allocation11]]  ;;  %v531_v42 = vstv %s1661_s30  ;;  %v1726_v58 = vsel %vm491_vm4, %v490_v35, %v492_v48 }
  0xb2   : > { %v537_v36 = vstv %s1667_s7  ;;  %s1693_s15 = sld [smem:[#allocation11 + $0x1]]  ;;  %v511_v37 = vadd.f32 %v510_v28, %v508_v27 }
  0xb3   : > { %v525_v38 = vadd.f32 %v524_v29, %v521_v32  ;;  %v538_v39 = vmul.f32 %v537_v36, %v1583_v0  ;;  %v540_v40 = vstv %s1670_s12  ;;  %s1697_s10 = sld [smem:[#allocation11 + $0x2]] }
  0xb4   : > { %v541_v43 = vmul.f32 %v1586_v1, %v540_v40  ;;  %v544_v44 = vstv %s1674_s19  ;;  %s1704_s29 = sld [smem:[#allocation11 + $0x3]]  ;;  %vm512_vm5 = vcmp.ge.f32.partialorder %v511_v37, 0.0  ;;  %v513_v50 = vmul.f32 0.1, %v511_v37 }
  0xb5   : > { %v529_v46 = vadd.f32 %v528_v33, %v525_v38  ;;  %v545_v47 = vmul.f32 %v1597_v6, %v544_v44  ;;  %v548_v0 = vstv %s1679_s28  ;;  %s1710_s18 = sld [smem:[#allocation12]] }
  0xb6   : > { %v542_v49 = vadd.f32 %v541_v43, %v538_v39  ;;  %v549_v1 = vmul.f32 %v1605_v12, %v548_v0  ;;  %s1713_s13 = sld [smem:[#allocation11 + $0x10]]  ;;  %v552_v53 = vstv %s1684_s9  ;;  %v1733_v62 = vsel %vm512_vm5, %v511_v37, %v513_v50 }
  0xb7   : > { %v532_v51 = vadd.f32 %v531_v42, %v529_v46  ;;  %v558_v52 = vstv %s1687_s11  ;;  %s1716_s14 = sld [smem:[#allocation11 + $0x11]] }
  0xb8   : > { %v546_v6 = vadd.f32 %v545_v47, %v542_v49  ;;  %v559_v54 = vmul.f32 %v558_v52, %v1664_v13  ;;  %v561_v55 = vstv %s1693_s15  ;;  %s957_s20 = sld [smem:[#allocation11 + $0x12]] }
  0xb9   : > { %vm533_vm6 = vcmp.ge.f32.partialorder %v532_v51, 0.0  ;;  %v534_v56 = vmul.f32 0.1, %v532_v51  ;;  %v562_v12 = vmul.f32 %v561_v55, %v1690_v34  ;;  %v565_v57 = vstv %s1697_s10  ;;  %s1723_s27 = sld [smem:[#allocation11 + $0x13]] }
  0xba   : > { %v550_v59 = vadd.f32 %v549_v1, %v546_v6  ;;  %v566_v60 = vmul.f32 %v565_v57, %v1699_v41  ;;  %v569_v61 = vstv %s1704_s29  ;;  %s1730_s17 = sld [smem:[#allocation12 + $0x4]]  ;;  %v970_v6 = vld [vmem:[%s1552_s4 + $0x2] sm:$0x3] }
  0xbb   : > { %v563_v63 = vadd.f32 %v562_v12, %v559_v54  ;;  %v570_v2 = vmul.f32 %v569_v61, %v1706_v45  ;;  %s960_s3 = sld [smem:[#allocation11 + $0x4]]  ;;  %v1736_v3 = vsel %vm533_vm6, %v532_v51, %v534_v56  ;;  %v573_v8 = vstv %s1710_s18 }
  0xbc   : > { %v553_v4 = vadd.f32 %v552_v53, %v550_v59  ;;  %v576_v5 = vstv %s1713_s13  ;;  %s961_s5 = sld [smem:[#allocation11 + $0x5]] }
  0xbd   : > { %v567_v7 = vadd.f32 %v566_v60, %v563_v63  ;;  %v577_v9 = vmul.f32 %v576_v5, %v1726_v58  ;;  %v579_v10 = vstv %s1716_s14  ;;  %s962_s30 = sld [smem:[#allocation11 + $0x6]] }
  0xbe   : > { %vm554_vm7 = vcmp.ge.f32.partialorder %v553_v4, 0.0  ;;  %v555_v11 = vmul.f32 0.1, %v553_v4  ;;  %v580_v14 = vmul.f32 %v579_v10, %v1733_v62  ;;  %v583_v15 = vstv %s957_s20  ;;  %s963_s7 = sld [smem:[#allocation11 + $0x7]]  ;;  %s1765_s20 = scalar_lea.vmem [#allocation14], %s1548_s2 }
  0xbf   : > { %v571_v16 = vadd.f32 %v570_v2, %v567_v7  ;;  %v584_v17 = vmul.f32 %v583_v15, %v1736_v3  ;;  %v587_v18 = vstv %s1723_s27  ;;  %s1745_s12 = sld [smem:[#allocation12 + $0x1]] }
  0xc0   : > { %v1747_v19 = vsel %vm554_vm7, %v553_v4, %v555_v11  ;;  %v581_v20 = vadd.f32 %v580_v14, %v577_v9  ;;  %s965_s19 = sld [smem:[#allocation11 + $0x14]]  ;;  %v591_v28 = vstv %s1730_s17 }
  0xc1   : > { %v574_v21 = vadd.f32 %v573_v8, %v571_v16  ;;  %v588_v22 = vmul.f32 %v587_v18, %v1747_v19  ;;  %v598_v24 = vstv %s960_s3  ;;  %s966_s28 = sld [smem:[#allocation11 + $0x15]] }
  0xc2   : > { %v585_v25 = vadd.f32 %v584_v17, %v581_v20  ;;  %v599_v26 = vmul.f32 %v598_v24, %v1664_v13  ;;  %v601_v27 = vstv %s961_s5  ;;  %s967_s9 = sld [smem:[#allocation11 + $0x16]] }
  0xc3   : > { %v602_v29 = vmul.f32 %v601_v27, %v1690_v34  ;;  %v605_v30 = vstv %s962_s30  ;;  %s968_s11 = sld [smem:[#allocation11 + $0x17]]  ;;  %v594_v32 = vmul.f32 %v593_v23, %v574_v21 }
  0xc4   : > { %v589_v31 = vadd.f32 %v588_v22, %v585_v25  ;;  %v606_v33 = vmul.f32 %v605_v30, %v1699_v41  ;;  %v609_v35 = vstv %s963_s7  ;;  %s1755_s15 = sld [smem:[#allocation12 + $0x5]]  ;;  %v982_v25 = vld [vmem:[%s1552_s4 + $0x4] sm:$0x3] }
  0xc5   : > { %v603_v36 = vadd.f32 %v602_v29, %v599_v26  ;;  %v610_v37 = vmul.f32 %v609_v35, %v1706_v45  ;;  %s972_s10 = sld [smem:[#allocation11 + $0x8]]  ;;  %v613_v46 = vstv %s1745_s12 }
  0xc6   : > { %v592_v38 = vadd.f32 %v591_v28, %v589_v31  ;;  %v616_v39 = vstv %s965_s19  ;;  %s973_s29 = sld [smem:[#allocation11 + $0x9]] }
  0xc7   : > { %v607_v40 = vadd.f32 %v606_v33, %v603_v36  ;;  %v617_v42 = vmul.f32 %v616_v39, %v1726_v58  ;;  %v619_v43 = vstv %s966_s28  ;;  %s974_s18 = sld [smem:[#allocation11 + $0xa]] }
  0xc8   : > { %v595_v44 = vadd.f32 %v594_v32, %v592_v38  ;;  %v620_v47 = vmul.f32 %v619_v43, %v1733_v62  ;;  %v623_v0 = vstv %s967_s9  ;;  %s975_s13 = sld [smem:[#allocation11 + $0xb]] }
  0xc9   : > { %v611_v48 = vadd.f32 %v610_v37, %v607_v40  ;;  %v624_v49 = vmul.f32 %v623_v0, %v1736_v3  ;;  %v627_v1 = vstv %s968_s11  ;;  %s1762_s14 = sld [smem:[#allocation12 + $0x2]] }
  0xca   : > { %596 = vst [vmem:[%s1765_s20] sm:$0x3] %v595_v44  ;;  %v621_v50 = vadd.f32 %v620_v47, %v617_v42  ;;  %v628_v51 = vmul.f32 %v627_v1, %v1747_v19  ;;  %s977_s27 = sld [smem:[#allocation11 + $0x18]]  ;;  %v631_v12 = vstv %s1755_s15 }
  0xcb   : > { %v614_v52 = vadd.f32 %v613_v46, %v611_v48  ;;  %v640_v53 = vstv %s972_s10  ;;  %s978_s17 = sld [smem:[#allocation11 + $0x19]] }
  0xcc   : > { %v625_v54 = vadd.f32 %v624_v49, %v621_v50  ;;  %v641_v55 = vmul.f32 %v640_v53, %v1664_v13  ;;  %v643_v56 = vstv %s973_s29  ;;  %s979_s3 = sld [smem:[#allocation11 + $0x1a]] }
  0xcd   : > { %v644_v57 = vmul.f32 %v643_v56, %v1690_v34  ;;  %v647_v59 = vstv %s974_s18  ;;  %s980_s2 = sld [smem:[#allocation11 + $0x1b]]  ;;  %v635_v61 = vmul.f32 %v970_v6, %v614_v52  ;;  %s1003_s18 = sshll.u32 %s1320_s24, 7 }
  0xce   : > { %v629_v60 = vadd.f32 %v628_v51, %v625_v54  ;;  %v648_v63 = vmul.f32 %v647_v59, %v1699_v41  ;;  %v651_v2 = vstv %s975_s13  ;;  %s1774_s5 = sld [smem:[#allocation12 + $0x6]]  ;;  %s738_s13 = sshll.u32 %s1765_s20, 4  ;;  %s1805_s13 = int_to_ptr.vmem [resolvable:$true] %s738_s13 }
  0xcf   : > { %v645_v4 = vadd.f32 %v644_v57, %v641_v55  ;;  %v652_v5 = vmul.f32 %v651_v2, %v1706_v45  ;;  %s984_s30 = sld [smem:[#allocation11 + $0xc]]  ;;  %v655_v15 = vstv %s1762_s14  ;;  %s1338_s24 = smov [#allocation14]  }
  0xd0   : > { %v632_v7 = vadd.f32 %v631_v12, %v629_v60  ;;  %v658_v8 = vstv %s977_s27  ;;  %s985_s7 = sld [smem:[#allocation11 + $0xd]] }
  0xd1   : > { %v649_v9 = vadd.f32 %v648_v63, %v645_v4  ;;  %v659_v10 = vmul.f32 %v658_v8, %v1726_v58  ;;  %v661_v11 = vstv %s978_s17  ;;  %s986_s12 = sld [smem:[#allocation11 + $0xe]]  ;;  %s1803_s17 = scalar_lea.hbm %s1860_s6, %s1003_s18 }
  0xd2   : > { %v636_v14 = vadd.f32 %v635_v61, %v632_v7  ;;  %v662_v16 = vmul.f32 %v661_v11, %v1733_v62  ;;  %v665_v17 = vstv %s979_s3  ;;  %s987_s19 = sld [smem:[#allocation11 + $0xf]]  ;;  %s1232_s3 = scalar_lea.vmem %s1805_s13, 128 }
  0xd3   : > { %v653_v18 = vadd.f32 %v652_v5, %v649_v9  ;;  %v666_v20 = vmul.f32 %v665_v17, %v1736_v3  ;;  %v669_v21 = vstv %s980_s2  ;;  %s1781_s28 = sld [smem:[#allocation12 + $0x3]]  ;;  %p1233_p13 = scmp.ne.s32.totalorder %s1805_s13, %s1232_s3 }
  0xd4   : > { %971 = vst [vmem:[%s1765_s20 + $0x2] sm:$0x3] %v636_v14  ;;  %v663_v22 = vadd.f32 %v662_v16, %v659_v10  ;;  %v670_v23 = vmul.f32 %v669_v21, %v1747_v19  ;;  %s989_s9 = sld [smem:[#allocation11 + $0x1c]]  ;;  %v673_v30 = vstv %s1774_s5  ;;  %s1236_s2 = sshll.u32 %s1338_s24, 4  ;;  %s1237_s2 = int_to_ptr.vmem [resolvable:$false] %s1236_s2 }
  0xd5   : > { %v656_v24 = vadd.f32 %v655_v15, %v653_v18  ;;  %v682_v26 = vstv %s984_s30  ;;  %s990_s11 = sld [smem:[#allocation11 + $0x1d]]  ;;  %p1234_p2 = pnand %p1233_p13, %p1494_p5 }
  0xd6   : > { %v667_v27 = vadd.f32 %v666_v20, %v663_v22  ;;  %v683_v28 = vmul.f32 %v682_v26, %v1664_v13  ;;  %v685_v29 = vstv %s985_s7  ;;  %s991_s15 = sld [smem:[#allocation11 + $0x1e]]  ;;  %s1238_s5 = scalar_lea.vmem %s1237_s2, 256 }
  0xd7   : > { %v686_v31 = vmul.f32 %v685_v29, %v1690_v34  ;;  %v689_v32 = vstv %s986_s12  ;;  %s992_s10 = sld [smem:[#allocation11 + $0x1f]]  ;;  %v677_v35 = vmul.f32 %v982_v25, %v656_v24  ;;  %p1235_p4 = pneg %p1234_p2 }
  0xd8   : > { %v671_v33 = vadd.f32 %v670_v23, %v667_v27  ;;  %v690_v36 = vmul.f32 %v689_v32, %v1699_v41  ;;  %v693_v37 = vstv %s987_s19  ;;  %s993_s29 = sld [smem:[#allocation12 + $0x7]]  ;;  %p1239_p8 = scmp.lt.s32.totalorder %s1805_s13, %s1237_s2 }
  0xd9   : > { %v687_v38 = vadd.f32 %v686_v31, %v683_v28  ;;  %v694_v39 = vmul.f32 %v693_v37, %v1706_v45  ;;  %v697_v46 = vstv %s1781_s28  ;;  %p1240_p9 = scmp.lt.s32.totalorder %s1238_s5, %s1232_s3 }
  0xda   : > { %v674_v40 = vadd.f32 %v673_v30, %v671_v33  ;;  %v700_v13 = vstv %s989_s9 }
  0xdb   : > { %v691_v42 = vadd.f32 %v690_v36, %v687_v38  ;;  %v701_v43 = vmul.f32 %v700_v13, %v1726_v58  ;;  %v703_v34 = vstv %s990_s11  ;;  %v994_v58 = vld [vmem:[%s1552_s4 + $0x6] sm:$0x3]  ;;  %s724_s4 = scalar_lea.sflag [#allocation4], %s1545_s0  ;;  %p1241_p3 = por %p1240_p9, %p1239_p8 }
  0xdc   : > { %v678_v44 = vadd.f32 %v677_v35, %v674_v40  ;;  %v704_v47 = vmul.f32 %v703_v34, %v1733_v62  ;;  %v707_v41 = vstv %s991_s15 }
  0xdd   : > { %v695_v0 = vadd.f32 %v694_v39, %v691_v42  ;;  %v708_v48 = vmul.f32 %v707_v41, %v1736_v3  ;;  %v711_v49 = vstv %s992_s10  ;;  %p1242_p11 = pnand %p1241_p3, %p1235_p4 }
  0xde   : > { %983 = vst [vmem:[%s1765_s20 + $0x4] sm:$0x3] %v678_v44  ;;  %v705_v45 = vadd.f32 %v704_v47, %v701_v43  ;;  %v712_v1 = vmul.f32 %v711_v49, %v1747_v19  ;;  %v715_v52 = vstv %s993_s29 }
  0xdf   : > { %v698_v50 = vadd.f32 %v697_v46, %v695_v0 }
  0xe0   : > { %v709_v51 = vadd.f32 %v708_v48, %v705_v45 }
  0xe1   : > { %v719_v53 = vmul.f32 %v994_v58, %v698_v50 }
  0xe2   : > { %v713_v6 = vadd.f32 %v712_v1, %v709_v51 }
  0xe4   : > { %v716_v62 = vadd.f32 %v715_v52, %v713_v6 }
  0xe6   : > { %v720_v3 = vadd.f32 %v719_v53, %v716_v62 }
  0xe8   : > { %995 = vst [vmem:[%s1765_s20 + $0x6] sm:$0x3] %v720_v3 }
  0xe9   : > { %1245 = shalt.err (!%p1242_p11)
}
  0xea   : > { %s1246_s20 = scalar_lea.hbm %s1803_s17, 128  ;;  %s1250_s12 = scalar_lea.hbm %s1860_s6, 256 }
  0xeb   : > { %p1247_p12 = scmp.ne.s32.totalorder %s1803_s17, %s1246_s20  ;;  %p1251_p1 = scmp.lt.s32.totalorder %s1803_s17, %s1860_s6 }
  0xec   : > { %p1252_p10 = scmp.lt.s32.totalorder %s1250_s12, %s1246_s20 }
  0xed   : > { %p1248_p0 = pnand %p1247_p12, %p1494_p5 }
  0xee   : > { %p1253_p7 = por %p1252_p10, %p1251_p1 }
  0xef   : > { %p1249_p6 = pneg %p1248_p0 }
  0xf1   : > { %p1254_p13 = pnand %p1253_p7, %p1249_p6 }
  0xf3   : > { %1257 = shalt.err (!%p1254_p13)
}
  0xf4   : > { %s1339_s9 = smov 32   ;;  %s1340_s11 = smov 2  }
  0xf5   : > { %1024 = dma.vmem_to_hbm [thread:$0]  (%p1494_p5), %s1805_s13, 128, %s1803_s17, %s724_s4, %s1339_s9, %s1339_s9, %s1340_s11  }
  0xf6 PF: > { %s753_s15 = sand.u32 1, %s1308_s21   ;;  %p1894_p2 = scmp.ne.s32.totalorder %s1876_s8, 0 }
  0xf7   : > { %p1895_p4 = scmp.ge.s32.totalorder %s1328_s26, 2  ;;  %s754_s10 = scalar_lea.sflag [#allocation4], %s753_s15 }
  0xf9   : > { %p1047_p8 = pnand %p1895_p4, %p1894_p2 }
  0xfb   : > { %p1048_p9 = pneg %p1047_p8 }
  0xfd   : > { %1303 = dma.done.wait (%p1048_p9), %s754_s10, 128  }
  0xfe   : > { %1305 = vsyncadd (%p1048_p9), %s754_s10, 4294967168  ;;  %s28_s26 = sadd.s32 1, %s1328_s26   ;;  %s1896_s16 = sld [smem:[#allocation22_spill]] }
  0xff   : > { %p25_p3 = scmp.ge.s32.totalorder %s28_s26, 4   ;;  %s1897_s0 = sld [smem:[#allocation21_spill]] }
 0x100   : > { %s1898_s21 = smov %s1312_s22  ;;  %s1899_s22 = smov %s1316_s23 }
 0x101   : > { %s1901_s24 = smov %s1324_s25  ;;  %27 = sbr.rel (!%p25_p3) target bundleno = 17 (0x11), region = 128 }
 0x104   : > { %s1900_s23 = smov %s1896_s16 }
 0x105   : > { %s1902_s25 = smov %s1897_s0 }
 0x106   :  { %759 = vsyncpa [#allocation3], 1 }
 0x107   :  { %761 = vsyncpa [#allocation3 + $0x1], 1 }
 0x108   :  { %762 = vsyncpa [#allocation7], 1 }
 0x109   :  { %764 = vsyncpa [#allocation7 + $0x1], 1 }
 0x10a   :  { %765 = vsyncpa [#allocation4], 1 }
 0x10b   :  { %767 = vsyncpa [#allocation4 + $0x1], 1 }
 0x10c   :  { %768 = vsyncpa [#allocation5], 1 }
 0x10d   :  { %770 = vsyncpa [#allocation5 + $0x1], 1 }
 0x10e   :  { %771 = vsyncpa [#allocation10], 1 }
 0x10f   :  { %772 = vsyncpa [#allocation13], 1 }

</bundles_post_ra>
